<compile_context>
chip_gen: v7x
topology: tpu7x:2x2x1
jax: 0.10.0
libtpu: 0.0.40
codegen_flags: <defaults>
</compile_context>

<pallas_src>
import jax
import jax.numpy as jnp
from jax.experimental import pallas as pl
from jax.experimental.pallas import tpu as pltpu


def _round_up(x, m):
    return (x + m - 1) // m * m


# ----------------------------------------------------------------------------
# Tiled matmul + bias kernel (used for input and output projections).
# ----------------------------------------------------------------------------
def matmul_bias_kernel(x_ref, w_ref, b_ref, o_ref):
    o_ref[...] = (jnp.dot(x_ref[...], w_ref[...],
                          preferred_element_type=jnp.float32)
                  + b_ref[...]).astype(o_ref.dtype)


def matmul_bias(x, w, b, *, tm=256, tn=512, out_dtype=jnp.float32):
    """x: (M, K), w: (K, N), b: (N,) -> (M, N) out_dtype.

    Operands are cast to bf16 (MXU-native on v5e/v6e/v7x) with f32
    accumulation.  M and N are padded up to 8/128-aligned tiles; the padded
    rows/cols are sliced off the result.
    """
    M, K = x.shape
    N = w.shape[1]
    tm = min(tm, _round_up(M, 8))
    tn = min(tn, _round_up(N, 128))
    Mp = _round_up(M, tm)
    Np = _round_up(N, tn)

    x = x.astype(jnp.bfloat16)
    w = w.astype(jnp.bfloat16)
    b = b.astype(jnp.float32)
    if Mp != M:
        x = jnp.pad(x, ((0, Mp - M), (0, 0)))
    if Np != N:
        w = jnp.pad(w, ((0, 0), (0, Np - N)))
        b = jnp.pad(b, (0, Np - N))
    b2 = b.reshape(1, Np)

    out = pl.pallas_call(
        matmul_bias_kernel,
        out_shape=jax.ShapeDtypeStruct((Mp, Np), out_dtype),
        grid_spec=pltpu.PrefetchScalarGridSpec(
            num_scalar_prefetch=0,
            grid=(Mp // tm, Np // tn),
            in_specs=[
                pl.BlockSpec((tm, K), lambda i, j: (i, 0)),   # x rows tile
                pl.BlockSpec((K, tn), lambda i, j: (0, j)),   # weight N-tile
                pl.BlockSpec((1, tn), lambda i, j: (0, j)),   # bias N-tile
            ],
            out_specs=pl.BlockSpec((tm, tn), lambda i, j: (i, j)),
        ),
        compiler_params=pltpu.CompilerParams(
            dimension_semantics=("parallel", "parallel"),
            vmem_limit_bytes=48 * 1024 * 1024,
        ),
    )(x, w, b2)

    if Mp != M or Np != N:
        out = out[:M, :N]
    return out


# ----------------------------------------------------------------------------
# Recurrent LSTM cell kernel: time-chunked grid, register-carried h/c.
# ----------------------------------------------------------------------------
def lstm_recurrent_kernel(xproj_ref, whh_hbm_ref, h_out_ref,
                          whh_vmem, h_ref, c_ref):
    H = h_ref.shape[1]
    T = xproj_ref.shape[0]          # static time-chunk length

    @pl.when(pl.program_id(0) == 0)
    def _():
        # Single-buffered copy of the grid-invariant recurrent weight
        # (HBM -> VMEM once for the whole pallas_call), plus state init.
        pltpu.sync_copy(whh_hbm_ref, whh_vmem)
        h_ref[...] = jnp.zeros_like(h_ref)
        c_ref[...] = jnp.zeros_like(c_ref)

    def step(t, carry):
        h, c = carry                # f32 (B, H), register-resident
        # Only h @ W_hh^T + elementwise sits on the serial path; the input
        # projection (incl. both biases) was hoisted into X_proj.
        gates = xproj_ref[t] + jnp.dot(
            h.astype(jnp.bfloat16), whh_vmem[...],
            preferred_element_type=jnp.float32)
        i_g = jax.nn.sigmoid(gates[:, 0 * H:1 * H])
        f_g = jax.nn.sigmoid(gates[:, 1 * H:2 * H])
        g_g = jnp.tanh(gates[:, 2 * H:3 * H])
        o_g = jax.nn.sigmoid(gates[:, 3 * H:4 * H])
        c_new = f_g * c + i_g * g_g
        h_new = o_g * jnp.tanh(c_new)
        h_out_ref[t] = h_new.astype(h_out_ref.dtype)   # lane-dense (B, H) store
        return (h_new, c_new)

    h_fin, c_fin = jax.lax.fori_loop(
        0, T, step, (h_ref[...], c_ref[...]), unroll=True)
    # Write the carried state back to VMEM once per chunk (not per step).
    h_ref[...] = h_fin
    c_ref[...] = c_fin


def lstm_recurrence(x_proj, w_hh_t, *, t_chunk=32):
    """x_proj: (S, B, 4H) f32, w_hh_t: (H, 4H) bf16. Returns (S, B, H) bf16."""
    S, B, G = x_proj.shape
    H = G // 4
    t_chunk = min(t_chunk, S)
    while S % t_chunk != 0:          # leading (time) dim has no (8,128) rule
        t_chunk -= 1

    return pl.pallas_call(
        lstm_recurrent_kernel,
        out_shape=jax.ShapeDtypeStruct((S, B, H), jnp.bfloat16),
        grid_spec=pltpu.PrefetchScalarGridSpec(
            num_scalar_prefetch=0,
            grid=(S // t_chunk,),
            in_specs=[
                pl.BlockSpec((t_chunk, B, G), lambda g: (g, 0, 0)),  # X_proj chunk
                pl.BlockSpec(memory_space=pl.ANY),                   # W_hh^T in HBM
            ],
            out_specs=pl.BlockSpec((t_chunk, B, H), lambda g: (g, 0, 0)),
            scratch_shapes=[
                pltpu.VMEM((H, G), jnp.bfloat16),   # W_hh^T, single-buffered
                pltpu.VMEM((B, H), jnp.float32),    # h carry across chunks
                pltpu.VMEM((B, H), jnp.float32),    # c carry across chunks
            ],
        ),
        compiler_params=pltpu.CompilerParams(
            dimension_semantics=("arbitrary",),     # sequential in time
            vmem_limit_bytes=48 * 1024 * 1024,      # fits v7x 64 MiB physical
        ),
    )(x_proj, w_hh_t.astype(jnp.bfloat16))


# ----------------------------------------------------------------------------
# Full model forward.
# ----------------------------------------------------------------------------
def lstm_seq_model_apply(tokens_seq, params):
    """tokens_seq: (seq_len, batch) int32 -> logits (seq_len, batch, vocab)."""
    S, B = tokens_seq.shape
    E = params["embedding"].shape[1]
    H = params["w_hh"].shape[1]
    V = params["w_out"].shape[0]

    emb = params["embedding"][tokens_seq]                    # gather (glue)

    # (1) input projection for all timesteps (hoisted out of the recurrence)
    x_proj = matmul_bias(
        emb.reshape(S * B, E),
        params["w_ih"].T,                                    # (E, 4H)
        params["b_ih"] + params["b_hh"],                     # (4H,)
    ).reshape(S, B, 4 * H)                                   # f32

    # (2) sequential LSTM recurrence (bf16 h_all; it is a bf16 matmul operand)
    h_all = lstm_recurrence(x_proj, params["w_hh"].T)        # (S, B, H) bf16

    # (3) vocab projection for all timesteps (hoisted out of the recurrence)
    logits = matmul_bias(
        h_all.reshape(S * B, H),
        params["w_out"].T,                                   # (H, V)
        params["b_out"],                                     # (V,)
    ).reshape(S, B, V)
    return logits


# ----------------------------------------------------------------------------
# Pure-JAX f32 reference (lax.scan) mirroring PyTorch LSTM semantics.
# ----------------------------------------------------------------------------
def reference_forward(tokens_seq, params):
    emb = params["embedding"][tokens_seq]
    H = params["w_hh"].shape[1]
    B = tokens_seq.shape[1]
    w_ih_t = params["w_ih"].T
    w_hh_t = params["w_hh"].T
    b = params["b_ih"] + params["b_hh"]

    def step(carry, x_t):
        h, c = carry
        gates = x_t @ w_ih_t + h @ w_hh_t + b
        i = jax.nn.sigmoid(gates[:, 0 * H:1 * H])
        f = jax.nn.sigmoid(gates[:, 1 * H:2 * H])
        g = jnp.tanh(gates[:, 2 * H:3 * H])
        o = jax.nn.sigmoid(gates[:, 3 * H:4 * H])
        c = f * c + i * g
        h = o * jnp.tanh(c)
        return (h, c), h

    init = (jnp.zeros((B, H), jnp.float32), jnp.zeros((B, H), jnp.float32))
    _, outs = jax.lax.scan(step, init, emb)
    return outs @ params["w_out"].T + params["b_out"]


def init_params(key, vocab_size, embed_size, hidden_size):
    ks = jax.random.split(key, 7)
    k = 1.0 / jnp.sqrt(hidden_size)
    return {
        "embedding": jax.random.normal(ks[0], (vocab_size, embed_size), jnp.float32),
        "w_ih": jax.random.uniform(ks[1], (4 * hidden_size, embed_size), jnp.float32, -k, k),
        "w_hh": jax.random.uniform(ks[2], (4 * hidden_size, hidden_size), jnp.float32, -k, k),
        "b_ih": jax.random.uniform(ks[3], (4 * hidden_size,), jnp.float32, -k, k),
        "b_hh": jax.random.uniform(ks[4], (4 * hidden_size,), jnp.float32, -k, k),
        "w_out": jax.random.uniform(ks[5], (vocab_size, hidden_size), jnp.float32, -k, k),
        "b_out": jax.random.uniform(ks[6], (vocab_size,), jnp.float32, -k, k),
    }


if __name__ == "__main__":
    SEQ_LEN, BATCH = 8, 8
    VOCAB, EMBED, HIDDEN = 256, 128, 128   # small shapes (module default is 1024)

    key = jax.random.PRNGKey(0)
    pkey, tkey = jax.random.split(key)
    params = init_params(pkey, VOCAB, EMBED, HIDDEN)
    tokens = jax.random.randint(tkey, (SEQ_LEN, BATCH), 0, VOCAB, dtype=jnp.int32)

    logits = jax.jit(lstm_seq_model_apply)(tokens, params)
    jax.block_until_ready(logits)

    ref = reference_forward(tokens, params)
    assert logits.shape == (SEQ_LEN, BATCH, VOCAB)
    # Tolerance loosened vs the pure-f32 variant: matmul operands run on the
    # MXU in bf16 (f32 accumulation), which keeps errors ~1e-2 on these shapes.
    assert jnp.allclose(logits, ref, atol=1e-1, rtol=1e-1)

    print("KERNEL_OK")
</pallas_src>

<mosaic_0001>
module attributes {stable_mosaic.version = 11 : i64} {
  func.func @matmul_bias_kernel(%arg0: i32, %arg1: i32, %arg2: memref<64x128xbf16, #tpu.memory_space<vmem>>, %arg3: memref<128x512xbf16, #tpu.memory_space<vmem>>, %arg4: memref<1x512xf32, #tpu.memory_space<vmem>>, %arg5: memref<64x512xf32, #tpu.memory_space<vmem>>) attributes {dimension_semantics = [#tpu.dimension_semantics<parallel>, #tpu.dimension_semantics<parallel>], iteration_bounds = array<i64: 1, 1>, scalar_prefetch = 0 : i64, scratch_operands = 0 : i64, tpu.core_type = #tpu.core_type<tc>, window_params = [{transform_indices = @transform_0, window_bounds = array<i64: 64, 128>}, {transform_indices = @transform_1, window_bounds = array<i64: 128, 512>}, {transform_indices = @transform_2, window_bounds = array<i64: 1, 512>}, {transform_indices = @transform_3, window_bounds = array<i64: 64, 512>}]} {
    %c0 = arith.constant 0 : index
    %c0_0 = arith.constant 0 : index
    %0 = vector.load %arg2[%c0, %c0_0] : memref<64x128xbf16, #tpu.memory_space<vmem>>, vector<64x128xbf16>
    %c0_1 = arith.constant 0 : index
    %c0_2 = arith.constant 0 : index
    %1 = vector.load %arg3[%c0_1, %c0_2] : memref<128x512xbf16, #tpu.memory_space<vmem>>, vector<128x512xbf16>
    %cst = arith.constant dense<0.000000e+00> : vector<64x512xf32>
    %2 = tpu.matmul %0, %1, %cst {dimension_numbers = #tpu.dot_dimension_numbers<[1], [0], [0], [1], [0, 0, 1, 1], [], []>} : vector<64x128xbf16>, vector<128x512xbf16>, vector<64x512xf32> -> vector<64x512xf32>
    %c0_3 = arith.constant 0 : index
    %c0_4 = arith.constant 0 : index
    %3 = vector.load %arg4[%c0_3, %c0_4] : memref<1x512xf32, #tpu.memory_space<vmem>>, vector<1x512xf32>
    %4 = vector.broadcast %3 : vector<1x512xf32> to vector<64x512xf32>
    %5 = arith.addf %2, %4 : vector<64x512xf32>
    %c0_5 = arith.constant 0 : index
    %c0_6 = arith.constant 0 : index
    %6 = vector.load %arg5[%c0_5, %c0_6] : memref<64x512xf32, #tpu.memory_space<vmem>>, vector<64x512xf32>
    tpu.vector_store %arg5[%c0_5, %c0_6], %5 {strides = array<i32>} : memref<64x512xf32, #tpu.memory_space<vmem>>, vector<64x512xf32>,
    return
  }
  func.func @transform_0(%arg0: i32, %arg1: i32) -> (i32, i32) {
    %c0_i32 = arith.constant 0 : i32
    %c0_i32_0 = arith.constant 0 : i32
    return %arg0, %c0_i32 : i32, i32
  }
  func.func @transform_1(%arg0: i32, %arg1: i32) -> (i32, i32) {
    %c0_i32 = arith.constant 0 : i32
    %c0_i32_0 = arith.constant 0 : i32
    return %c0_i32, %arg1 : i32, i32
  }
  func.func @transform_2(%arg0: i32, %arg1: i32) -> (i32, i32) {
    %c0_i32 = arith.constant 0 : i32
    %c0_i32_0 = arith.constant 0 : i32
    return %c0_i32, %arg1 : i32, i32
  }
  func.func @transform_3(%arg0: i32, %arg1: i32) -> (i32, i32) {
    %c0_i32 = arith.constant 0 : i32
    return %arg0, %arg1 : i32, i32
  }
}

module attributes {stable_mosaic.version = 11 : i64} {
  func.func @lstm_recurrent_kernel(%arg0: i32, %arg1: memref<8x8x512xf32, #tpu.memory_space<vmem>>, %arg2: memref<128x512xbf16, #tpu.memory_space<any>>, %arg3: memref<8x8x128xbf16, #tpu.memory_space<vmem>>, %arg4: memref<128x512xbf16, #tpu.memory_space<vmem>>, %arg5: memref<8x128xf32, #tpu.memory_space<vmem>>, %arg6: memref<8x128xf32, #tpu.memory_space<vmem>>) attributes {dimension_semantics = [#tpu.dimension_semantics<arbitrary>], iteration_bounds = array<i64: 1>, scalar_prefetch = 0 : i64, scratch_operands = 3 : i64, tpu.core_type = #tpu.core_type<tc>, window_params = [{transform_indices = @transform_0, window_bounds = array<i64: 8, 8, 512>}, {}, {transform_indices = @transform_2, window_bounds = array<i64: 8, 8, 128>}]} {
    %c0_i32 = arith.constant 0 : i32
    %0 = arith.cmpi eq, %arg0, %c0_i32 : i32
    %1 = arith.extui %0 : i1 to i32
    %c0_i32_0 = arith.constant 0 : i32
    %2 = arith.cmpi ne, %1, %c0_i32_0 : i32
    scf.if %2 {
      "tpu.region"() ({
        %307 = tpu.sem_alloc : memref<!tpu.dma_semaphore, #tpu.memory_space<semaphore_mem>>
        tpu.enqueue_dma source(%arg2 : memref<128x512xbf16, #tpu.memory_space<any>>) target(%arg4 : memref<128x512xbf16, #tpu.memory_space<vmem>>) target_semaphore(%307 : memref<!tpu.dma_semaphore, #tpu.memory_space<semaphore_mem>>)
        tpu.wait_dma2 semaphore(%307 : memref<!tpu.dma_semaphore, #tpu.memory_space<semaphore_mem>>) src(%arg2 : memref<128x512xbf16, #tpu.memory_space<any>>) dst(%arg4 : memref<128x512xbf16, #tpu.memory_space<vmem>>)
        tpu.yield
      }) : () -> ()
      %cst_88 = arith.constant 0.000000e+00 : f32
      %303 = vector.broadcast %cst_88 : f32 to vector<8x128xf32>
      %c0_89 = arith.constant 0 : index
      %c0_90 = arith.constant 0 : index
      %304 = vector.load %arg5[%c0_89, %c0_90] : memref<8x128xf32, #tpu.memory_space<vmem>>, vector<8x128xf32>
      tpu.vector_store %arg5[%c0_89, %c0_90], %303 {strides = array<i32>} : memref<8x128xf32, #tpu.memory_space<vmem>>, vector<8x128xf32>,
      %cst_91 = arith.constant 0.000000e+00 : f32
      %305 = vector.broadcast %cst_91 : f32 to vector<8x128xf32>
      %c0_92 = arith.constant 0 : index
      %c0_93 = arith.constant 0 : index
      %306 = vector.load %arg6[%c0_92, %c0_93] : memref<8x128xf32, #tpu.memory_space<vmem>>, vector<8x128xf32>
      tpu.vector_store %arg6[%c0_92, %c0_93], %305 {strides = array<i32>} : memref<8x128xf32, #tpu.memory_space<vmem>>, vector<8x128xf32>,
    } else {
    }
    %c0 = arith.constant 0 : index
    %c0_1 = arith.constant 0 : index
    %3 = vector.load %arg5[%c0, %c0_1] : memref<8x128xf32, #tpu.memory_space<vmem>>, vector<8x128xf32>
    %c0_2 = arith.constant 0 : index
    %c0_3 = arith.constant 0 : index
    %4 = vector.load %arg6[%c0_2, %c0_3] : memref<8x128xf32, #tpu.memory_space<vmem>>, vector<8x128xf32>
    %c0_i32_4 = arith.constant 0 : i32
    %5 = arith.index_cast %c0_i32_4 : i32 to index
    %c0_5 = arith.constant 0 : index
    %c0_6 = arith.constant 0 : index
    %6 = vector.load %arg1[%5, %c0_5, %c0_6] : memref<8x8x512xf32, #tpu.memory_space<vmem>>, vector<1x8x512xf32>
    %7 = vector.shape_cast %6 : vector<1x8x512xf32> to vector<8x512xf32>
    %8 = arith.truncf %3 : vector<8x128xf32> to vector<8x128xbf16>
    %c0_7 = arith.constant 0 : index
    %c0_8 = arith.constant 0 : index
    %9 = vector.load %arg4[%c0_7, %c0_8] : memref<128x512xbf16, #tpu.memory_space<vmem>>, vector<128x512xbf16>
    %cst = arith.constant dense<0.000000e+00> : vector<8x512xf32>
    %10 = tpu.matmul %8, %9, %cst {dimension_numbers = #tpu.dot_dimension_numbers<[1], [0], [0], [1], [0, 0, 1, 1], [], []>} : vector<8x128xbf16>, vector<128x512xbf16>, vector<8x512xf32> -> vector<8x512xf32>
    %11 = arith.addf %7, %10 : vector<8x512xf32>
    %12 = vector.extract_strided_slice %11 {offsets = [0, 0], sizes = [8, 128], strides = [1, 1]} : vector<8x512xf32> to vector<8x128xf32>
    %13 = arith.negf %12 : vector<8x128xf32>
    %14 = math.exp %13 : vector<8x128xf32>
    %cst_9 = arith.constant 1.000000e+00 : f32
    %15 = vector.broadcast %cst_9 : f32 to vector<8x128xf32>
    %16 = arith.addf %15, %14 : vector<8x128xf32>
    %17 = arith.divf %15, %16 : vector<8x128xf32>
    %18 = vector.extract_strided_slice %11 {offsets = [0, 128], sizes = [8, 128], strides = [1, 1]} : vector<8x512xf32> to vector<8x128xf32>
    %19 = arith.negf %18 : vector<8x128xf32>
    %20 = math.exp %19 : vector<8x128xf32>
    %cst_10 = arith.constant 1.000000e+00 : f32
    %21 = vector.broadcast %cst_10 : f32 to vector<8x128xf32>
    %22 = arith.addf %21, %20 : vector<8x128xf32>
    %23 = arith.divf %21, %22 : vector<8x128xf32>
    %24 = vector.extract_strided_slice %11 {offsets = [0, 256], sizes = [8, 128], strides = [1, 1]} : vector<8x512xf32> to vector<8x128xf32>
    %25 = math.tanh %24 : vector<8x128xf32>
    %26 = vector.extract_strided_slice %11 {offsets = [0, 384], sizes = [8, 128], strides = [1, 1]} : vector<8x512xf32> to vector<8x128xf32>
    %27 = arith.negf %26 : vector<8x128xf32>
    %28 = math.exp %27 : vector<8x128xf32>
    %cst_11 = arith.constant 1.000000e+00 : f32
    %29 = vector.broadcast %cst_11 : f32 to vector<8x128xf32>
    %30 = arith.addf %29, %28 : vector<8x128xf32>
    %31 = arith.divf %29, %30 : vector<8x128xf32>
    %32 = arith.mulf %23, %4 : vector<8x128xf32>
    %33 = arith.mulf %17, %25 : vector<8x128xf32>
    %34 = arith.addf %32, %33 : vector<8x128xf32>
    %35 = math.tanh %34 : vector<8x128xf32>
    %36 = arith.mulf %31, %35 : vector<8x128xf32>
    %37 = arith.truncf %36 : vector<8x128xf32> to vector<8x128xbf16>
    %38 = arith.index_cast %c0_i32_4 : i32 to index
    %c0_12 = arith.constant 0 : index
    %c0_13 = arith.constant 0 : index
    %39 = vector.load %arg3[%38, %c0_12, %c0_13] : memref<8x8x128xbf16, #tpu.memory_space<vmem>>, vector<1x8x128xbf16>
    %40 = vector.shape_cast %39 : vector<1x8x128xbf16> to vector<8x128xbf16>
    %41 = vector.shape_cast %37 : vector<8x128xbf16> to vector<1x8x128xbf16>
    tpu.vector_store %arg3[%38, %c0_12, %c0_13], %41 {strides = array<i32>} : memref<8x8x128xbf16, #tpu.memory_space<vmem>>, vector<1x8x128xbf16>,
    %c1_i32 = arith.constant 1 : i32
    %42 = arith.index_cast %c1_i32 : i32 to index
    %c0_14 = arith.constant 0 : index
    %c0_15 = arith.constant 0 : index
    %43 = vector.load %arg1[%42, %c0_14, %c0_15] : memref<8x8x512xf32, #tpu.memory_space<vmem>>, vector<1x8x512xf32>
    %44 = vector.shape_cast %43 : vector<1x8x512xf32> to vector<8x512xf32>
    %45 = arith.truncf %36 : vector<8x128xf32> to vector<8x128xbf16>
    %c0_16 = arith.constant 0 : index
    %c0_17 = arith.constant 0 : index
    %46 = vector.load %arg4[%c0_16, %c0_17] : memref<128x512xbf16, #tpu.memory_space<vmem>>, vector<128x512xbf16>
    %cst_18 = arith.constant dense<0.000000e+00> : vector<8x512xf32>
    %47 = tpu.matmul %45, %46, %cst_18 {dimension_numbers = #tpu.dot_dimension_numbers<[1], [0], [0], [1], [0, 0, 1, 1], [], []>} : vector<8x128xbf16>, vector<128x512xbf16>, vector<8x512xf32> -> vector<8x512xf32>
    %48 = arith.addf %44, %47 : vector<8x512xf32>
    %49 = vector.extract_strided_slice %48 {offsets = [0, 0], sizes = [8, 128], strides = [1, 1]} : vector<8x512xf32> to vector<8x128xf32>
    %50 = arith.negf %49 : vector<8x128xf32>
    %51 = math.exp %50 : vector<8x128xf32>
    %cst_19 = arith.constant 1.000000e+00 : f32
    %52 = vector.broadcast %cst_19 : f32 to vector<8x128xf32>
    %53 = arith.addf %52, %51 : vector<8x128xf32>
    %54 = arith.divf %52, %53 : vector<8x128xf32>
    %55 = vector.extract_strided_slice %48 {offsets = [0, 128], sizes = [8, 128], strides = [1, 1]} : vector<8x512xf32> to vector<8x128xf32>
    %56 = arith.negf %55 : vector<8x128xf32>
    %57 = math.exp %56 : vector<8x128xf32>
    %cst_20 = arith.constant 1.000000e+00 : f32
    %58 = vector.broadcast %cst_20 : f32 to vector<8x128xf32>
    %59 = arith.addf %58, %57 : vector<8x128xf32>
    %60 = arith.divf %58, %59 : vector<8x128xf32>
    %61 = vector.extract_strided_slice %48 {offsets = [0, 256], sizes = [8, 128], strides = [1, 1]} : vector<8x512xf32> to vector<8x128xf32>
    %62 = math.tanh %61 : vector<8x128xf32>
    %63 = vector.extract_strided_slice %48 {offsets = [0, 384], sizes = [8, 128], strides = [1, 1]} : vector<8x512xf32> to vector<8x128xf32>
    %64 = arith.negf %63 : vector<8x128xf32>
    %65 = math.exp %64 : vector<8x128xf32>
    %cst_21 = arith.constant 1.000000e+00 : f32
    %66 = vector.broadcast %cst_21 : f32 to vector<8x128xf32>
    %67 = arith.addf %66, %65 : vector<8x128xf32>
    %68 = arith.divf %66, %67 : vector<8x128xf32>
    %69 = arith.mulf %60, %34 : vector<8x128xf32>
    %70 = arith.mulf %54, %62 : vector<8x128xf32>
    %71 = arith.addf %69, %70 : vector<8x128xf32>
    %72 = math.tanh %71 : vector<8x128xf32>
    %73 = arith.mulf %68, %72 : vector<8x128xf32>
    %74 = arith.truncf %73 : vector<8x128xf32> to vector<8x128xbf16>
    %75 = arith.index_cast %c1_i32 : i32 to index
    %c0_22 = arith.constant 0 : index
    %c0_23 = arith.constant 0 : index
    %76 = vector.load %arg3[%75, %c0_22, %c0_23] : memref<8x8x128xbf16, #tpu.memory_space<vmem>>, vector<1x8x128xbf16>
    %77 = vector.shape_cast %76 : vector<1x8x128xbf16> to vector<8x128xbf16>
    %78 = vector.shape_cast %74 : vector<8x128xbf16> to vector<1x8x128xbf16>
    tpu.vector_store %arg3[%75, %c0_22, %c0_23], %78 {strides = array<i32>} : memref<8x8x128xbf16, #tpu.memory_space<vmem>>, vector<1x8x128xbf16>,
    %c2_i32 = arith.constant 2 : i32
    %79 = arith.index_cast %c2_i32 : i32 to index
    %c0_24 = arith.constant 0 : index
    %c0_25 = arith.constant 0 : index
    %80 = vector.load %arg1[%79, %c0_24, %c0_25] : memref<8x8x512xf32, #tpu.memory_space<vmem>>, vector<1x8x512xf32>
    %81 = vector.shape_cast %80 : vector<1x8x512xf32> to vector<8x512xf32>
    %82 = arith.truncf %73 : vector<8x128xf32> to vector<8x128xbf16>
    %c0_26 = arith.constant 0 : index
    %c0_27 = arith.constant 0 : index
    %83 = vector.load %arg4[%c0_26, %c0_27] : memref<128x512xbf16, #tpu.memory_space<vmem>>, vector<128x512xbf16>
    %cst_28 = arith.constant dense<0.000000e+00> : vector<8x512xf32>
    %84 = tpu.matmul %82, %83, %cst_28 {dimension_numbers = #tpu.dot_dimension_numbers<[1], [0], [0], [1], [0, 0, 1, 1], [], []>} : vector<8x128xbf16>, vector<128x512xbf16>, vector<8x512xf32> -> vector<8x512xf32>
    %85 = arith.addf %81, %84 : vector<8x512xf32>
    %86 = vector.extract_strided_slice %85 {offsets = [0, 0], sizes = [8, 128], strides = [1, 1]} : vector<8x512xf32> to vector<8x128xf32>
    %87 = arith.negf %86 : vector<8x128xf32>
    %88 = math.exp %87 : vector<8x128xf32>
    %cst_29 = arith.constant 1.000000e+00 : f32
    %89 = vector.broadcast %cst_29 : f32 to vector<8x128xf32>
    %90 = arith.addf %89, %88 : vector<8x128xf32>
    %91 = arith.divf %89, %90 : vector<8x128xf32>
    %92 = vector.extract_strided_slice %85 {offsets = [0, 128], sizes = [8, 128], strides = [1, 1]} : vector<8x512xf32> to vector<8x128xf32>
    %93 = arith.negf %92 : vector<8x128xf32>
    %94 = math.exp %93 : vector<8x128xf32>
    %cst_30 = arith.constant 1.000000e+00 : f32
    %95 = vector.broadcast %cst_30 : f32 to vector<8x128xf32>
    %96 = arith.addf %95, %94 : vector<8x128xf32>
    %97 = arith.divf %95, %96 : vector<8x128xf32>
    %98 = vector.extract_strided_slice %85 {offsets = [0, 256], sizes = [8, 128], strides = [1, 1]} : vector<8x512xf32> to vector<8x128xf32>
    %99 = math.tanh %98 : vector<8x128xf32>
    %100 = vector.extract_strided_slice %85 {offsets = [0, 384], sizes = [8, 128], strides = [1, 1]} : vector<8x512xf32> to vector<8x128xf32>
    %101 = arith.negf %100 : vector<8x128xf32>
    %102 = math.exp %101 : vector<8x128xf32>
    %cst_31 = arith.constant 1.000000e+00 : f32
    %103 = vector.broadcast %cst_31 : f32 to vector<8x128xf32>
    %104 = arith.addf %103, %102 : vector<8x128xf32>
    %105 = arith.divf %103, %104 : vector<8x128xf32>
    %106 = arith.mulf %97, %71 : vector<8x128xf32>
    %107 = arith.mulf %91, %99 : vector<8x128xf32>
    %108 = arith.addf %106, %107 : vector<8x128xf32>
    %109 = math.tanh %108 : vector<8x128xf32>
    %110 = arith.mulf %105, %109 : vector<8x128xf32>
    %111 = arith.truncf %110 : vector<8x128xf32> to vector<8x128xbf16>
    %112 = arith.index_cast %c2_i32 : i32 to index
    %c0_32 = arith.constant 0 : index
    %c0_33 = arith.constant 0 : index
    %113 = vector.load %arg3[%112, %c0_32, %c0_33] : memref<8x8x128xbf16, #tpu.memory_space<vmem>>, vector<1x8x128xbf16>
    %114 = vector.shape_cast %113 : vector<1x8x128xbf16> to vector<8x128xbf16>
    %115 = vector.shape_cast %111 : vector<8x128xbf16> to vector<1x8x128xbf16>
    tpu.vector_store %arg3[%112, %c0_32, %c0_33], %115 {strides = array<i32>} : memref<8x8x128xbf16, #tpu.memory_space<vmem>>, vector<1x8x128xbf16>,
    %c3_i32 = arith.constant 3 : i32
    %116 = arith.index_cast %c3_i32 : i32 to index
    %c0_34 = arith.constant 0 : index
    %c0_35 = arith.constant 0 : index
    %117 = vector.load %arg1[%116, %c0_34, %c0_35] : memref<8x8x512xf32, #tpu.memory_space<vmem>>, vector<1x8x512xf32>
    %118 = vector.shape_cast %117 : vector<1x8x512xf32> to vector<8x512xf32>
    %119 = arith.truncf %110 : vector<8x128xf32> to vector<8x128xbf16>
    %c0_36 = arith.constant 0 : index
    %c0_37 = arith.constant 0 : index
    %120 = vector.load %arg4[%c0_36, %c0_37] : memref<128x512xbf16, #tpu.memory_space<vmem>>, vector<128x512xbf16>
    %cst_38 = arith.constant dense<0.000000e+00> : vector<8x512xf32>
    %121 = tpu.matmul %119, %120, %cst_38 {dimension_numbers = #tpu.dot_dimension_numbers<[1], [0], [0], [1], [0, 0, 1, 1], [], []>} : vector<8x128xbf16>, vector<128x512xbf16>, vector<8x512xf32> -> vector<8x512xf32>
    %122 = arith.addf %118, %121 : vector<8x512xf32>
    %123 = vector.extract_strided_slice %122 {offsets = [0, 0], sizes = [8, 128], strides = [1, 1]} : vector<8x512xf32> to vector<8x128xf32>
    %124 = arith.negf %123 : vector<8x128xf32>
    %125 = math.exp %124 : vector<8x128xf32>
    %cst_39 = arith.constant 1.000000e+00 : f32
    %126 = vector.broadcast %cst_39 : f32 to vector<8x128xf32>
    %127 = arith.addf %126, %125 : vector<8x128xf32>
    %128 = arith.divf %126, %127 : vector<8x128xf32>
    %129 = vector.extract_strided_slice %122 {offsets = [0, 128], sizes = [8, 128], strides = [1, 1]} : vector<8x512xf32> to vector<8x128xf32>
    %130 = arith.negf %129 : vector<8x128xf32>
    %131 = math.exp %130 : vector<8x128xf32>
    %cst_40 = arith.constant 1.000000e+00 : f32
    %132 = vector.broadcast %cst_40 : f32 to vector<8x128xf32>
    %133 = arith.addf %132, %131 : vector<8x128xf32>
    %134 = arith.divf %132, %133 : vector<8x128xf32>
    %135 = vector.extract_strided_slice %122 {offsets = [0, 256], sizes = [8, 128], strides = [1, 1]} : vector<8x512xf32> to vector<8x128xf32>
    %136 = math.tanh %135 : vector<8x128xf32>
    %137 = vector.extract_strided_slice %122 {offsets = [0, 384], sizes = [8, 128], strides = [1, 1]} : vector<8x512xf32> to vector<8x128xf32>
    %138 = arith.negf %137 : vector<8x128xf32>
    %139 = math.exp %138 : vector<8x128xf32>
    %cst_41 = arith.constant 1.000000e+00 : f32
    %140 = vector.broadcast %cst_41 : f32 to vector<8x128xf32>
    %141 = arith.addf %140, %139 : vector<8x128xf32>
    %142 = arith.divf %140, %141 : vector<8x128xf32>
    %143 = arith.mulf %134, %108 : vector<8x128xf32>
    %144 = arith.mulf %128, %136 : vector<8x128xf32>
    %145 = arith.addf %143, %144 : vector<8x128xf32>
    %146 = math.tanh %145 : vector<8x128xf32>
    %147 = arith.mulf %142, %146 : vector<8x128xf32>
    %148 = arith.truncf %147 : vector<8x128xf32> to vector<8x128xbf16>
    %149 = arith.index_cast %c3_i32 : i32 to index
    %c0_42 = arith.constant 0 : index
    %c0_43 = arith.constant 0 : index
    %150 = vector.load %arg3[%149, %c0_42, %c0_43] : memref<8x8x128xbf16, #tpu.memory_space<vmem>>, vector<1x8x128xbf16>
    %151 = vector.shape_cast %150 : vector<1x8x128xbf16> to vector<8x128xbf16>
    %152 = vector.shape_cast %148 : vector<8x128xbf16> to vector<1x8x128xbf16>
    tpu.vector_store %arg3[%149, %c0_42, %c0_43], %152 {strides = array<i32>} : memref<8x8x128xbf16, #tpu.memory_space<vmem>>, vector<1x8x128xbf16>,
    %c4_i32 = arith.constant 4 : i32
    %153 = arith.index_cast %c4_i32 : i32 to index
    %c0_44 = arith.constant 0 : index
    %c0_45 = arith.constant 0 : index
    %154 = vector.load %arg1[%153, %c0_44, %c0_45] : memref<8x8x512xf32, #tpu.memory_space<vmem>>, vector<1x8x512xf32>
    %155 = vector.shape_cast %154 : vector<1x8x512xf32> to vector<8x512xf32>
    %156 = arith.truncf %147 : vector<8x128xf32> to vector<8x128xbf16>
    %c0_46 = arith.constant 0 : index
    %c0_47 = arith.constant 0 : index
    %157 = vector.load %arg4[%c0_46, %c0_47] : memref<128x512xbf16, #tpu.memory_space<vmem>>, vector<128x512xbf16>
    %cst_48 = arith.constant dense<0.000000e+00> : vector<8x512xf32>
    %158 = tpu.matmul %156, %157, %cst_48 {dimension_numbers = #tpu.dot_dimension_numbers<[1], [0], [0], [1], [0, 0, 1, 1], [], []>} : vector<8x128xbf16>, vector<128x512xbf16>, vector<8x512xf32> -> vector<8x512xf32>
    %159 = arith.addf %155, %158 : vector<8x512xf32>
    %160 = vector.extract_strided_slice %159 {offsets = [0, 0], sizes = [8, 128], strides = [1, 1]} : vector<8x512xf32> to vector<8x128xf32>
    %161 = arith.negf %160 : vector<8x128xf32>
    %162 = math.exp %161 : vector<8x128xf32>
    %cst_49 = arith.constant 1.000000e+00 : f32
    %163 = vector.broadcast %cst_49 : f32 to vector<8x128xf32>
    %164 = arith.addf %163, %162 : vector<8x128xf32>
    %165 = arith.divf %163, %164 : vector<8x128xf32>
    %166 = vector.extract_strided_slice %159 {offsets = [0, 128], sizes = [8, 128], strides = [1, 1]} : vector<8x512xf32> to vector<8x128xf32>
    %167 = arith.negf %166 : vector<8x128xf32>
    %168 = math.exp %167 : vector<8x128xf32>
    %cst_50 = arith.constant 1.000000e+00 : f32
    %169 = vector.broadcast %cst_50 : f32 to vector<8x128xf32>
    %170 = arith.addf %169, %168 : vector<8x128xf32>
    %171 = arith.divf %169, %170 : vector<8x128xf32>
    %172 = vector.extract_strided_slice %159 {offsets = [0, 256], sizes = [8, 128], strides = [1, 1]} : vector<8x512xf32> to vector<8x128xf32>
    %173 = math.tanh %172 : vector<8x128xf32>
    %174 = vector.extract_strided_slice %159 {offsets = [0, 384], sizes = [8, 128], strides = [1, 1]} : vector<8x512xf32> to vector<8x128xf32>
    %175 = arith.negf %174 : vector<8x128xf32>
    %176 = math.exp %175 : vector<8x128xf32>
    %cst_51 = arith.constant 1.000000e+00 : f32
    %177 = vector.broadcast %cst_51 : f32 to vector<8x128xf32>
    %178 = arith.addf %177, %176 : vector<8x128xf32>
    %179 = arith.divf %177, %178 : vector<8x128xf32>
    %180 = arith.mulf %171, %145 : vector<8x128xf32>
    %181 = arith.mulf %165, %173 : vector<8x128xf32>
    %182 = arith.addf %180, %181 : vector<8x128xf32>
    %183 = math.tanh %182 : vector<8x128xf32>
    %184 = arith.mulf %179, %183 : vector<8x128xf32>
    %185 = arith.truncf %184 : vector<8x128xf32> to vector<8x128xbf16>
    %186 = arith.index_cast %c4_i32 : i32 to index
    %c0_52 = arith.constant 0 : index
    %c0_53 = arith.constant 0 : index
    %187 = vector.load %arg3[%186, %c0_52, %c0_53] : memref<8x8x128xbf16, #tpu.memory_space<vmem>>, vector<1x8x128xbf16>
    %188 = vector.shape_cast %187 : vector<1x8x128xbf16> to vector<8x128xbf16>
    %189 = vector.shape_cast %185 : vector<8x128xbf16> to vector<1x8x128xbf16>
    tpu.vector_store %arg3[%186, %c0_52, %c0_53], %189 {strides = array<i32>} : memref<8x8x128xbf16, #tpu.memory_space<vmem>>, vector<1x8x128xbf16>,
    %c5_i32 = arith.constant 5 : i32
    %190 = arith.index_cast %c5_i32 : i32 to index
    %c0_54 = arith.constant 0 : index
    %c0_55 = arith.constant 0 : index
    %191 = vector.load %arg1[%190, %c0_54, %c0_55] : memref<8x8x512xf32, #tpu.memory_space<vmem>>, vector<1x8x512xf32>
    %192 = vector.shape_cast %191 : vector<1x8x512xf32> to vector<8x512xf32>
    %193 = arith.truncf %184 : vector<8x128xf32> to vector<8x128xbf16>
    %c0_56 = arith.constant 0 : index
    %c0_57 = arith.constant 0 : index
    %194 = vector.load %arg4[%c0_56, %c0_57] : memref<128x512xbf16, #tpu.memory_space<vmem>>, vector<128x512xbf16>
    %cst_58 = arith.constant dense<0.000000e+00> : vector<8x512xf32>
    %195 = tpu.matmul %193, %194, %cst_58 {dimension_numbers = #tpu.dot_dimension_numbers<[1], [0], [0], [1], [0, 0, 1, 1], [], []>} : vector<8x128xbf16>, vector<128x512xbf16>, vector<8x512xf32> -> vector<8x512xf32>
    %196 = arith.addf %192, %195 : vector<8x512xf32>
    %197 = vector.extract_strided_slice %196 {offsets = [0, 0], sizes = [8, 128], strides = [1, 1]} : vector<8x512xf32> to vector<8x128xf32>
    %198 = arith.negf %197 : vector<8x128xf32>
    %199 = math.exp %198 : vector<8x128xf32>
    %cst_59 = arith.constant 1.000000e+00 : f32
    %200 = vector.broadcast %cst_59 : f32 to vector<8x128xf32>
    %201 = arith.addf %200, %199 : vector<8x128xf32>
    %202 = arith.divf %200, %201 : vector<8x128xf32>
    %203 = vector.extract_strided_slice %196 {offsets = [0, 128], sizes = [8, 128], strides = [1, 1]} : vector<8x512xf32> to vector<8x128xf32>
    %204 = arith.negf %203 : vector<8x128xf32>
    %205 = math.exp %204 : vector<8x128xf32>
    %cst_60 = arith.constant 1.000000e+00 : f32
    %206 = vector.broadcast %cst_60 : f32 to vector<8x128xf32>
    %207 = arith.addf %206, %205 : vector<8x128xf32>
    %208 = arith.divf %206, %207 : vector<8x128xf32>
    %209 = vector.extract_strided_slice %196 {offsets = [0, 256], sizes = [8, 128], strides = [1, 1]} : vector<8x512xf32> to vector<8x128xf32>
    %210 = math.tanh %209 : vector<8x128xf32>
    %211 = vector.extract_strided_slice %196 {offsets = [0, 384], sizes = [8, 128], strides = [1, 1]} : vector<8x512xf32> to vector<8x128xf32>
    %212 = arith.negf %211 : vector<8x128xf32>
    %213 = math.exp %212 : vector<8x128xf32>
    %cst_61 = arith.constant 1.000000e+00 : f32
    %214 = vector.broadcast %cst_61 : f32 to vector<8x128xf32>
    %215 = arith.addf %214, %213 : vector<8x128xf32>
    %216 = arith.divf %214, %215 : vector<8x128xf32>
    %217 = arith.mulf %208, %182 : vector<8x128xf32>
    %218 = arith.mulf %202, %210 : vector<8x128xf32>
    %219 = arith.addf %217, %218 : vector<8x128xf32>
    %220 = math.tanh %219 : vector<8x128xf32>
    %221 = arith.mulf %216, %220 : vector<8x128xf32>
    %222 = arith.truncf %221 : vector<8x128xf32> to vector<8x128xbf16>
    %223 = arith.index_cast %c5_i32 : i32 to index
    %c0_62 = arith.constant 0 : index
    %c0_63 = arith.constant 0 : index
    %224 = vector.load %arg3[%223, %c0_62, %c0_63] : memref<8x8x128xbf16, #tpu.memory_space<vmem>>, vector<1x8x128xbf16>
    %225 = vector.shape_cast %224 : vector<1x8x128xbf16> to vector<8x128xbf16>
    %226 = vector.shape_cast %222 : vector<8x128xbf16> to vector<1x8x128xbf16>
    tpu.vector_store %arg3[%223, %c0_62, %c0_63], %226 {strides = array<i32>} : memref<8x8x128xbf16, #tpu.memory_space<vmem>>, vector<1x8x128xbf16>,
    %c6_i32 = arith.constant 6 : i32
    %227 = arith.index_cast %c6_i32 : i32 to index
    %c0_64 = arith.constant 0 : index
    %c0_65 = arith.constant 0 : index
    %228 = vector.load %arg1[%227, %c0_64, %c0_65] : memref<8x8x512xf32, #tpu.memory_space<vmem>>, vector<1x8x512xf32>
    %229 = vector.shape_cast %228 : vector<1x8x512xf32> to vector<8x512xf32>
    %230 = arith.truncf %221 : vector<8x128xf32> to vector<8x128xbf16>
    %c0_66 = arith.constant 0 : index
    %c0_67 = arith.constant 0 : index
    %231 = vector.load %arg4[%c0_66, %c0_67] : memref<128x512xbf16, #tpu.memory_space<vmem>>, vector<128x512xbf16>
    %cst_68 = arith.constant dense<0.000000e+00> : vector<8x512xf32>
    %232 = tpu.matmul %230, %231, %cst_68 {dimension_numbers = #tpu.dot_dimension_numbers<[1], [0], [0], [1], [0, 0, 1, 1], [], []>} : vector<8x128xbf16>, vector<128x512xbf16>, vector<8x512xf32> -> vector<8x512xf32>
    %233 = arith.addf %229, %232 : vector<8x512xf32>
    %234 = vector.extract_strided_slice %233 {offsets = [0, 0], sizes = [8, 128], strides = [1, 1]} : vector<8x512xf32> to vector<8x128xf32>
    %235 = arith.negf %234 : vector<8x128xf32>
    %236 = math.exp %235 : vector<8x128xf32>
    %cst_69 = arith.constant 1.000000e+00 : f32
    %237 = vector.broadcast %cst_69 : f32 to vector<8x128xf32>
    %238 = arith.addf %237, %236 : vector<8x128xf32>
    %239 = arith.divf %237, %238 : vector<8x128xf32>
    %240 = vector.extract_strided_slice %233 {offsets = [0, 128], sizes = [8, 128], strides = [1, 1]} : vector<8x512xf32> to vector<8x128xf32>
    %241 = arith.negf %240 : vector<8x128xf32>
    %242 = math.exp %241 : vector<8x128xf32>
    %cst_70 = arith.constant 1.000000e+00 : f32
    %243 = vector.broadcast %cst_70 : f32 to vector<8x128xf32>
    %244 = arith.addf %243, %242 : vector<8x128xf32>
    %245 = arith.divf %243, %244 : vector<8x128xf32>
    %246 = vector.extract_strided_slice %233 {offsets = [0, 256], sizes = [8, 128], strides = [1, 1]} : vector<8x512xf32> to vector<8x128xf32>
    %247 = math.tanh %246 : vector<8x128xf32>
    %248 = vector.extract_strided_slice %233 {offsets = [0, 384], sizes = [8, 128], strides = [1, 1]} : vector<8x512xf32> to vector<8x128xf32>
    %249 = arith.negf %248 : vector<8x128xf32>
    %250 = math.exp %249 : vector<8x128xf32>
    %cst_71 = arith.constant 1.000000e+00 : f32
    %251 = vector.broadcast %cst_71 : f32 to vector<8x128xf32>
    %252 = arith.addf %251, %250 : vector<8x128xf32>
    %253 = arith.divf %251, %252 : vector<8x128xf32>
    %254 = arith.mulf %245, %219 : vector<8x128xf32>
    %255 = arith.mulf %239, %247 : vector<8x128xf32>
    %256 = arith.addf %254, %255 : vector<8x128xf32>
    %257 = math.tanh %256 : vector<8x128xf32>
    %258 = arith.mulf %253, %257 : vector<8x128xf32>
    %259 = arith.truncf %258 : vector<8x128xf32> to vector<8x128xbf16>
    %260 = arith.index_cast %c6_i32 : i32 to index
    %c0_72 = arith.constant 0 : index
    %c0_73 = arith.constant 0 : index
    %261 = vector.load %arg3[%260, %c0_72, %c0_73] : memref<8x8x128xbf16, #tpu.memory_space<vmem>>, vector<1x8x128xbf16>
    %262 = vector.shape_cast %261 : vector<1x8x128xbf16> to vector<8x128xbf16>
    %263 = vector.shape_cast %259 : vector<8x128xbf16> to vector<1x8x128xbf16>
    tpu.vector_store %arg3[%260, %c0_72, %c0_73], %263 {strides = array<i32>} : memref<8x8x128xbf16, #tpu.memory_space<vmem>>, vector<1x8x128xbf16>,
    %c7_i32 = arith.constant 7 : i32
    %264 = arith.index_cast %c7_i32 : i32 to index
    %c0_74 = arith.constant 0 : index
    %c0_75 = arith.constant 0 : index
    %265 = vector.load %arg1[%264, %c0_74, %c0_75] : memref<8x8x512xf32, #tpu.memory_space<vmem>>, vector<1x8x512xf32>
    %266 = vector.shape_cast %265 : vector<1x8x512xf32> to vector<8x512xf32>
    %267 = arith.truncf %258 : vector<8x128xf32> to vector<8x128xbf16>
    %c0_76 = arith.constant 0 : index
    %c0_77 = arith.constant 0 : index
    %268 = vector.load %arg4[%c0_76, %c0_77] : memref<128x512xbf16, #tpu.memory_space<vmem>>, vector<128x512xbf16>
    %cst_78 = arith.constant dense<0.000000e+00> : vector<8x512xf32>
    %269 = tpu.matmul %267, %268, %cst_78 {dimension_numbers = #tpu.dot_dimension_numbers<[1], [0], [0], [1], [0, 0, 1, 1], [], []>} : vector<8x128xbf16>, vector<128x512xbf16>, vector<8x512xf32> -> vector<8x512xf32>
    %270 = arith.addf %266, %269 : vector<8x512xf32>
    %271 = vector.extract_strided_slice %270 {offsets = [0, 0], sizes = [8, 128], strides = [1, 1]} : vector<8x512xf32> to vector<8x128xf32>
    %272 = arith.negf %271 : vector<8x128xf32>
    %273 = math.exp %272 : vector<8x128xf32>
    %cst_79 = arith.constant 1.000000e+00 : f32
    %274 = vector.broadcast %cst_79 : f32 to vector<8x128xf32>
    %275 = arith.addf %274, %273 : vector<8x128xf32>
    %276 = arith.divf %274, %275 : vector<8x128xf32>
    %277 = vector.extract_strided_slice %270 {offsets = [0, 128], sizes = [8, 128], strides = [1, 1]} : vector<8x512xf32> to vector<8x128xf32>
    %278 = arith.negf %277 : vector<8x128xf32>
    %279 = math.exp %278 : vector<8x128xf32>
    %cst_80 = arith.constant 1.000000e+00 : f32
    %280 = vector.broadcast %cst_80 : f32 to vector<8x128xf32>
    %281 = arith.addf %280, %279 : vector<8x128xf32>
    %282 = arith.divf %280, %281 : vector<8x128xf32>
    %283 = vector.extract_strided_slice %270 {offsets = [0, 256], sizes = [8, 128], strides = [1, 1]} : vector<8x512xf32> to vector<8x128xf32>
    %284 = math.tanh %283 : vector<8x128xf32>
    %285 = vector.extract_strided_slice %270 {offsets = [0, 384], sizes = [8, 128], strides = [1, 1]} : vector<8x512xf32> to vector<8x128xf32>
    %286 = arith.negf %285 : vector<8x128xf32>
    %287 = math.exp %286 : vector<8x128xf32>
    %cst_81 = arith.constant 1.000000e+00 : f32
    %288 = vector.broadcast %cst_81 : f32 to vector<8x128xf32>
    %289 = arith.addf %288, %287 : vector<8x128xf32>
    %290 = arith.divf %288, %289 : vector<8x128xf32>
    %291 = arith.mulf %282, %256 : vector<8x128xf32>
    %292 = arith.mulf %276, %284 : vector<8x128xf32>
    %293 = arith.addf %291, %292 : vector<8x128xf32>
    %294 = math.tanh %293 : vector<8x128xf32>
    %295 = arith.mulf %290, %294 : vector<8x128xf32>
    %296 = arith.truncf %295 : vector<8x128xf32> to vector<8x128xbf16>
    %297 = arith.index_cast %c7_i32 : i32 to index
    %c0_82 = arith.constant 0 : index
    %c0_83 = arith.constant 0 : index
    %298 = vector.load %arg3[%297, %c0_82, %c0_83] : memref<8x8x128xbf16, #tpu.memory_space<vmem>>, vector<1x8x128xbf16>
    %299 = vector.shape_cast %298 : vector<1x8x128xbf16> to vector<8x128xbf16>
    %300 = vector.shape_cast %296 : vector<8x128xbf16> to vector<1x8x128xbf16>
    tpu.vector_store %arg3[%297, %c0_82, %c0_83], %300 {strides = array<i32>} : memref<8x8x128xbf16, #tpu.memory_space<vmem>>, vector<1x8x128xbf16>,
    %c8_i32 = arith.constant 8 : i32
    %c0_84 = arith.constant 0 : index
    %c0_85 = arith.constant 0 : index
    %301 = vector.load %arg5[%c0_84, %c0_85] : memref<8x128xf32, #tpu.memory_space<vmem>>, vector<8x128xf32>
    tpu.vector_store %arg5[%c0_84, %c0_85], %295 {strides = array<i32>} : memref<8x128xf32, #tpu.memory_space<vmem>>, vector<8x128xf32>,
    %c0_86 = arith.constant 0 : index
    %c0_87 = arith.constant 0 : index
    %302 = vector.load %arg6[%c0_86, %c0_87] : memref<8x128xf32, #tpu.memory_space<vmem>>, vector<8x128xf32>
    tpu.vector_store %arg6[%c0_86, %c0_87], %293 {strides = array<i32>} : memref<8x128xf32, #tpu.memory_space<vmem>>, vector<8x128xf32>,
    return
  }
  func.func @transform_0(%arg0: i32) -> (i32, i32, i32) {
    %c0_i32 = arith.constant 0 : i32
    %c0_i32_0 = arith.constant 0 : i32
    %c0_i32_1 = arith.constant 0 : i32
    return %arg0, %c0_i32, %c0_i32_0 : i32, i32, i32
  }
  func.func @transform_2(%arg0: i32) -> (i32, i32, i32) {
    %c0_i32 = arith.constant 0 : i32
    %c0_i32_0 = arith.constant 0 : i32
    %c0_i32_1 = arith.constant 0 : i32
    return %arg0, %c0_i32, %c0_i32_0 : i32, i32, i32
  }
}

module attributes {stable_mosaic.version = 11 : i64} {
  func.func @matmul_bias_kernel(%arg0: i32, %arg1: i32, %arg2: memref<64x128xbf16, #tpu.memory_space<vmem>>, %arg3: memref<128x256xbf16, #tpu.memory_space<vmem>>, %arg4: memref<1x256xf32, #tpu.memory_space<vmem>>, %arg5: memref<64x256xf32, #tpu.memory_space<vmem>>) attributes {dimension_semantics = [#tpu.dimension_semantics<parallel>, #tpu.dimension_semantics<parallel>], iteration_bounds = array<i64: 1, 1>, scalar_prefetch = 0 : i64, scratch_operands = 0 : i64, tpu.core_type = #tpu.core_type<tc>, window_params = [{transform_indices = @transform_0, window_bounds = array<i64: 64, 128>}, {transform_indices = @transform_1, window_bounds = array<i64: 128, 256>}, {transform_indices = @transform_2, window_bounds = array<i64: 1, 256>}, {transform_indices = @transform_3, window_bounds = array<i64: 64, 256>}]} {
    %c0 = arith.constant 0 : index
    %c0_0 = arith.constant 0 : index
    %0 = vector.load %arg2[%c0, %c0_0] : memref<64x128xbf16, #tpu.memory_space<vmem>>, vector<64x128xbf16>
    %c0_1 = arith.constant 0 : index
    %c0_2 = arith.constant 0 : index
    %1 = vector.load %arg3[%c0_1, %c0_2] : memref<128x256xbf16, #tpu.memory_space<vmem>>, vector<128x256xbf16>
    %cst = arith.constant dense<0.000000e+00> : vector<64x256xf32>
    %2 = tpu.matmul %0, %1, %cst {dimension_numbers = #tpu.dot_dimension_numbers<[1], [0], [0], [1], [0, 0, 1, 1], [], []>} : vector<64x128xbf16>, vector<128x256xbf16>, vector<64x256xf32> -> vector<64x256xf32>
    %c0_3 = arith.constant 0 : index
    %c0_4 = arith.constant 0 : index
    %3 = vector.load %arg4[%c0_3, %c0_4] : memref<1x256xf32, #tpu.memory_space<vmem>>, vector<1x256xf32>
    %4 = vector.broadcast %3 : vector<1x256xf32> to vector<64x256xf32>
    %5 = arith.addf %2, %4 : vector<64x256xf32>
    %c0_5 = arith.constant 0 : index
    %c0_6 = arith.constant 0 : index
    %6 = vector.load %arg5[%c0_5, %c0_6] : memref<64x256xf32, #tpu.memory_space<vmem>>, vector<64x256xf32>
    tpu.vector_store %arg5[%c0_5, %c0_6], %5 {strides = array<i32>} : memref<64x256xf32, #tpu.memory_space<vmem>>, vector<64x256xf32>,
    return
  }
  func.func @transform_0(%arg0: i32, %arg1: i32) -> (i32, i32) {
    %c0_i32 = arith.constant 0 : i32
    %c0_i32_0 = arith.constant 0 : i32
    return %arg0, %c0_i32 : i32, i32
  }
  func.func @transform_1(%arg0: i32, %arg1: i32) -> (i32, i32) {
    %c0_i32 = arith.constant 0 : i32
    %c0_i32_0 = arith.constant 0 : i32
    return %c0_i32, %arg1 : i32, i32
  }
  func.func @transform_2(%arg0: i32, %arg1: i32) -> (i32, i32) {
    %c0_i32 = arith.constant 0 : i32
    %c0_i32_0 = arith.constant 0 : i32
    return %c0_i32, %arg1 : i32, i32
  }
  func.func @transform_3(%arg0: i32, %arg1: i32) -> (i32, i32) {
    %c0_i32 = arith.constant 0 : i32
    return %arg0, %arg1 : i32, i32
  }
}

</mosaic_0001>

<bundles_post_ra>
// kernel: lstm_seq_model_apply.3
= control target key start
LH: loop header
LB: loop body
LE: loop exit
PB: predicated region body
PF: predicated region fallthrough
CT: control target
= control target key end

     0   :  { %v532_v1 = vmov 0   ;;  %v57_v37 = vlaneseq  ;;  %s808_s1 = inlined_call_operand.vmem [shape: bf16[128,512], index: 1, kind: input, shape index: {}]   ;;  %s809_s0 = inlined_call_operand.vmem [shape: bf16[64,128], index: 0, kind: input, shape index: {}]   ;;  %s810_s2 = inlined_call_operand.vmem [shape: f32[1,512], index: 2, kind: input, shape index: {}]   ;;  %s811_s3 = inlined_call_operand.vmem [shape: f32[64,512], index: 3, kind: output, shape index: {}]  }
   0x1   :  { %v480_v0 = vld [vmem:[%s808_s1 + $0x4] ss:$16 sps:$4 sm:$0xff]   ;;  %293 = vmatprep.mubr.bf16.mxu0 %v532_v1  ;;  %366 = vmatprep.mubr.bf16.mxu1 %v532_v1  ;;  %v482_v2 = vld [vmem:[%s808_s1 + $0xc] ss:$16 sps:$4 sm:$0xff]   ;;  %v484_v3 = vld [vmem:[%s808_s1] ss:$16 sps:$4 sm:$0xff]  }
   0x2   :  { %261 = vmatprep.subr.bf16.mxu0 %v480_v0  ;;  %v485_v4 = vld [vmem:[%s808_s1 + $0x8] ss:$16 sps:$4 sm:$0xff]   ;;  %334 = vmatprep.subr.bf16.mxu1 %v482_v2  ;;  %v486_v5 = vld [vmem:[%s808_s1 + $0x24] ss:$16 sps:$4 sm:$0xff]   ;;  %v488_v6 = vld [vmem:[%s808_s1 + $0x2c] ss:$16 sps:$4 sm:$0xff]  }
   0x3   :  { %262 = vmatpush1.bf16.msra.mxu0 %v484_v3  ;;  %335 = vmatpush1.bf16.msra.mxu1 %v485_v4  ;;  %v490_v7 = vld [vmem:[%s808_s1 + $0x20] ss:$16 sps:$4 sm:$0xff]   ;;  %v491_v8 = vld [vmem:[%s808_s1 + $0x28] ss:$16 sps:$4 sm:$0xff]   ;;  %v492_v9 = vld [vmem:[%s808_s1 + $0x44] ss:$16 sps:$4 sm:$0xff]  }
   0x4   :  { %263 = vmatprep.subr.bf16.mxu0 %v486_v5  ;;  %336 = vmatprep.subr.bf16.mxu1 %v488_v6  ;;  %v494_v10 = vld [vmem:[%s808_s1 + $0x4c] ss:$16 sps:$4 sm:$0xff]   ;;  %v496_v11 = vld [vmem:[%s808_s1 + $0x40] ss:$16 sps:$4 sm:$0xff]   ;;  %v497_v12 = vld [vmem:[%s808_s1 + $0x48] ss:$16 sps:$4 sm:$0xff]  }
   0x5   :  { %v498_v13 = vld [vmem:[%s808_s1 + $0x64] ss:$16 sps:$4 sm:$0xff]   ;;  %v500_v14 = vld [vmem:[%s808_s1 + $0x6c] ss:$16 sps:$4 sm:$0xff]   ;;  %v502_v15 = vld [vmem:[%s808_s1 + $0x60] ss:$16 sps:$4 sm:$0xff]  }
   0x6   :  { %v503_v16 = vld [vmem:[%s808_s1 + $0x68] ss:$16 sps:$4 sm:$0xff]   ;;  %v504_v17 = vld [vmem:[%s808_s1 + $0x84] ss:$16 sps:$4 sm:$0xff]   ;;  %v506_v18 = vld [vmem:[%s808_s1 + $0x8c] ss:$16 sps:$4 sm:$0xff]  }
   0x7   :  { %264 = vmatpush1.bf16.msra.mxu0 %v490_v7  ;;  %337 = vmatpush1.bf16.msra.mxu1 %v491_v8  ;;  %v508_v19 = vld [vmem:[%s808_s1 + $0x80] ss:$16 sps:$4 sm:$0xff]   ;;  %v509_v20 = vld [vmem:[%s808_s1 + $0x88] ss:$16 sps:$4 sm:$0xff]   ;;  %v510_v21 = vld [vmem:[%s808_s1 + $0xa4] ss:$16 sps:$4 sm:$0xff]  }
   0x8   :  { %265 = vmatprep.subr.bf16.mxu0 %v492_v9  ;;  %338 = vmatprep.subr.bf16.mxu1 %v494_v10  ;;  %v512_v22 = vld [vmem:[%s808_s1 + $0xac] ss:$16 sps:$4 sm:$0xff]   ;;  %v514_v23 = vld [vmem:[%s808_s1 + $0xa0] ss:$16 sps:$4 sm:$0xff]   ;;  %v515_v24 = vld [vmem:[%s808_s1 + $0xa8] ss:$16 sps:$4 sm:$0xff]  }
   0x9   :  { %v516_v25 = vld [vmem:[%s808_s1 + $0xc4] ss:$16 sps:$4 sm:$0xff]   ;;  %v518_v26 = vld [vmem:[%s808_s1 + $0xcc] ss:$16 sps:$4 sm:$0xff]   ;;  %v520_v27 = vld [vmem:[%s808_s1 + $0xc0] ss:$16 sps:$4 sm:$0xff]  }
   0xa   :  { %v521_v28 = vld [vmem:[%s808_s1 + $0xc8] ss:$16 sps:$4 sm:$0xff]   ;;  %v522_v29 = vld [vmem:[%s808_s1 + $0xe4] ss:$16 sps:$4 sm:$0xff]   ;;  %v524_v30 = vld [vmem:[%s808_s1 + $0xec] ss:$16 sps:$4 sm:$0xff]  }
   0xb   :  { %266 = vmatpush1.bf16.msra.mxu0 %v496_v11  ;;  %339 = vmatpush1.bf16.msra.mxu1 %v497_v12  ;;  %v526_v31 = vld [vmem:[%s808_s1 + $0xe0] ss:$16 sps:$4 sm:$0xff]   ;;  %v527_v32 = vld [vmem:[%s808_s1 + $0xe8] ss:$16 sps:$4 sm:$0xff]   ;;  %v58_v38 = vshrl.u32 %v57_v37, 7 }
   0xc   :  { %267 = vmatprep.subr.bf16.mxu0 %v498_v13  ;;  %340 = vmatprep.subr.bf16.mxu1 %v500_v14  ;;  %v528_v33 = vld [vmem:[%s809_s0] sm:$0xff]   ;;  %v529_v34 = vld [vmem:[%s809_s0 + $0x8] sm:$0xff]   ;;  %v530_v35 = vld [vmem:[%s809_s0 + $0x10] sm:$0xff]  }
   0xd   :  { %v531_v36 = vld [vmem:[%s809_s0 + $0x18] sm:$0xff]   ;;  %v59_v39 = vsub.s32 0, %v58_v38  ;;  %v67_v40 = vsub.s32 2, %v58_v38  ;;  %v55_v41 = vld [vmem:[%s810_s2] sm:$0xf]  ;;  %v63_v42 = vsub.s32 1, %v58_v38 }
   0xe   :  { %v71_v43 = vsub.s32 3, %v58_v38 }
   0xf   :  { %268 = vmatpush1.bf16.msra.mxu0 %v502_v15  ;;  %341 = vmatpush1.bf16.msra.mxu1 %v503_v16  ;;  %v672_v44 = vrot.slane %v55_v41, %v59_v39  ;;  %v674_v45 = vrot.slane %v55_v41, %v67_v40  ;;  %v676_v46 = vrot.slane %v55_v41, %v63_v42 }
  0x10   :  { %269 = vmatprep.subr.bf16.mxu0 %v504_v17  ;;  %342 = vmatprep.subr.bf16.mxu1 %v506_v18  ;;  %v678_v47 = vrot.slane %v55_v41, %v71_v43 }
  0x13   :  { %270 = vmatpush1.bf16.msra.mxu0 %v508_v19  ;;  %343 = vmatpush1.bf16.msra.mxu1 %v509_v20 }
  0x14   :  { %271 = vmatprep.subr.bf16.mxu0 %v510_v21  ;;  %344 = vmatprep.subr.bf16.mxu1 %v512_v22 }
  0x17   :  { %272 = vmatpush1.bf16.msra.mxu0 %v514_v23  ;;  %345 = vmatpush1.bf16.msra.mxu1 %v515_v24 }
  0x18   :  { %273 = vmatprep.subr.bf16.mxu0 %v516_v25  ;;  %346 = vmatprep.subr.bf16.mxu1 %v518_v26 }
  0x1b   :  { %274 = vmatpush1.bf16.msra.mxu0 %v520_v27  ;;  %347 = vmatpush1.bf16.msra.mxu1 %v521_v28 }
  0x1c   :  { %275 = vmatprep.subr.bf16.mxu0 %v522_v29  ;;  %348 = vmatprep.subr.bf16.mxu1 %v524_v30 }
  0x1f   :  { %276 = vmatpush1.bf16.msra.mxu0 %v526_v31  ;;  %349 = vmatpush1.bf16.msra.mxu1 %v527_v32 }
  0x22   :  { %294 = vmatmul.mubr.bf16.vlgmr.msra.gmra.mrb[0].mxu0 %v528_v33  ;;  %367 = vmatmul.mubr.bf16.vlgmr.msra.gmra.mrb[0].mxu1 %v528_v33 }
  0x23   :  { %303 = vmatprep.mubr.bf16.mxu0 %v532_v1  ;;  %376 = vmatprep.mubr.bf16.mxu1 %v532_v1 }
  0x2a   :  { %304 = vmatmul.mubr.bf16.gmra.mrb[4].mxu0 %v529_v34  ;;  %377 = vmatmul.mubr.bf16.gmra.mrb[4].mxu1 %v529_v34 }
  0x2b   :  { %313 = vmatprep.mubr.bf16.mxu0 %v532_v1  ;;  %386 = vmatprep.mubr.bf16.mxu1 %v532_v1 }
  0x32   :  { %314 = vmatmul.mubr.bf16.gmra.mrb[8].mxu0 %v530_v35  ;;  %387 = vmatmul.mubr.bf16.gmra.mrb[8].mxu1 %v530_v35 }
  0x33   :  { %323 = vmatprep.mubr.bf16.mxu0 %v532_v1  ;;  %396 = vmatprep.mubr.bf16.mxu1 %v532_v1 }
  0x3a   :  { %324 = vmatmul.mubr.bf16.gmra.mrb[12].mxu0 %v531_v36  ;;  %397 = vmatmul.mubr.bf16.gmra.mrb[12].mxu1 %v531_v36 }
  0xf5   :  { %v295_v48 = vpop.f32.mrb[0].mxu0  ;;  %v368_v49 = vpop.f32.mrb[0].mxu1 }
  0xf6   :  { %v296_v50 = vadd.f32 %v295_v48, %v672_v44  ;;  %v369_v51 = vadd.f32 %v368_v49, %v674_v45  ;;  %v297_v52 = vpop.f32.mrb[1].mxu0  ;;  %v370_v53 = vpop.f32.mrb[1].mxu1 }
  0xf7   :  { %v298_v54 = vadd.f32 %v297_v52, %v676_v46  ;;  %v371_v55 = vadd.f32 %v370_v53, %v678_v47  ;;  %v299_v56 = vpop.f32.mrb[2].mxu0  ;;  %v372_v57 = vpop.f32.mrb[2].mxu1 }
  0xf8   :  { %407 = vst [vmem:[%s811_s3] sm:$0xff] %v296_v50  ;;  %409 = vst [vmem:[%s811_s3 + $0x10] sm:$0xff] %v369_v51  ;;  %v300_v58 = vadd.f32 %v299_v56, %v672_v44  ;;  %v373_v59 = vadd.f32 %v372_v57, %v674_v45  ;;  %v301_v60 = vpop.f32.mrb[3].mxu0  ;;  %v374_v61 = vpop.f32.mrb[3].mxu1 }
  0xf9   :  { %408 = vst [vmem:[%s811_s3 + $0x8] sm:$0xff] %v298_v54  ;;  %410 = vst [vmem:[%s811_s3 + $0x18] sm:$0xff] %v371_v55  ;;  %v302_v62 = vadd.f32 %v301_v60, %v676_v46  ;;  %v375_v63 = vadd.f32 %v374_v61, %v678_v47 }
  0xfa   :  { %411 = vst [vmem:[%s811_s3 + $0x20] sm:$0xff] %v300_v58  ;;  %413 = vst [vmem:[%s811_s3 + $0x30] sm:$0xff] %v373_v59 }
  0xfb   :  { %412 = vst [vmem:[%s811_s3 + $0x28] sm:$0xff] %v302_v62  ;;  %414 = vst [vmem:[%s811_s3 + $0x38] sm:$0xff] %v375_v63 }
  0xfd   :  { %v305_v0 = vpop.f32.mrb[4].mxu0  ;;  %v378_v1 = vpop.f32.mrb[4].mxu1 }
  0xfe   :  { %v306_v2 = vadd.f32 %v305_v0, %v672_v44  ;;  %v379_v3 = vadd.f32 %v378_v1, %v674_v45  ;;  %v307_v4 = vpop.f32.mrb[5].mxu0  ;;  %v380_v5 = vpop.f32.mrb[5].mxu1 }
  0xff   :  { %v308_v6 = vadd.f32 %v307_v4, %v676_v46  ;;  %v381_v7 = vadd.f32 %v380_v5, %v678_v47  ;;  %v309_v8 = vpop.f32.mrb[6].mxu0  ;;  %v382_v9 = vpop.f32.mrb[6].mxu1 }
 0x100   :  { %415 = vst [vmem:[%s811_s3 + $0x40] sm:$0xff] %v306_v2  ;;  %417 = vst [vmem:[%s811_s3 + $0x50] sm:$0xff] %v379_v3  ;;  %v310_v10 = vadd.f32 %v309_v8, %v672_v44  ;;  %v383_v11 = vadd.f32 %v382_v9, %v674_v45  ;;  %v311_v12 = vpop.f32.mrb[7].mxu0  ;;  %v384_v13 = vpop.f32.mrb[7].mxu1 }
 0x101   :  { %416 = vst [vmem:[%s811_s3 + $0x48] sm:$0xff] %v308_v6  ;;  %418 = vst [vmem:[%s811_s3 + $0x58] sm:$0xff] %v381_v7  ;;  %v312_v14 = vadd.f32 %v311_v12, %v676_v46  ;;  %v385_v15 = vadd.f32 %v384_v13, %v678_v47 }
 0x102   :  { %419 = vst [vmem:[%s811_s3 + $0x60] sm:$0xff] %v310_v10  ;;  %421 = vst [vmem:[%s811_s3 + $0x70] sm:$0xff] %v383_v11 }
 0x103   :  { %420 = vst [vmem:[%s811_s3 + $0x68] sm:$0xff] %v312_v14  ;;  %422 = vst [vmem:[%s811_s3 + $0x78] sm:$0xff] %v385_v15 }
 0x105   :  { %v315_v16 = vpop.f32.mrb[8].mxu0  ;;  %v388_v17 = vpop.f32.mrb[8].mxu1 }
 0x106   :  { %v316_v18 = vadd.f32 %v315_v16, %v672_v44  ;;  %v389_v19 = vadd.f32 %v388_v17, %v674_v45  ;;  %v317_v20 = vpop.f32.mrb[9].mxu0  ;;  %v390_v21 = vpop.f32.mrb[9].mxu1 }
 0x107   :  { %v318_v22 = vadd.f32 %v317_v20, %v676_v46  ;;  %v391_v23 = vadd.f32 %v390_v21, %v678_v47  ;;  %v319_v24 = vpop.f32.mrb[10].mxu0  ;;  %v392_v25 = vpop.f32.mrb[10].mxu1 }
 0x108   :  { %423 = vst [vmem:[%s811_s3 + $0x80] sm:$0xff] %v316_v18  ;;  %425 = vst [vmem:[%s811_s3 + $0x90] sm:$0xff] %v389_v19  ;;  %v320_v26 = vadd.f32 %v319_v24, %v672_v44  ;;  %v393_v27 = vadd.f32 %v392_v25, %v674_v45  ;;  %v321_v28 = vpop.f32.mrb[11].mxu0  ;;  %v394_v29 = vpop.f32.mrb[11].mxu1 }
 0x109   :  { %424 = vst [vmem:[%s811_s3 + $0x88] sm:$0xff] %v318_v22  ;;  %426 = vst [vmem:[%s811_s3 + $0x98] sm:$0xff] %v391_v23  ;;  %v322_v30 = vadd.f32 %v321_v28, %v676_v46  ;;  %v395_v31 = vadd.f32 %v394_v29, %v678_v47 }
 0x10a   :  { %427 = vst [vmem:[%s811_s3 + $0xa0] sm:$0xff] %v320_v26  ;;  %429 = vst [vmem:[%s811_s3 + $0xb0] sm:$0xff] %v393_v27 }
 0x10b   :  { %428 = vst [vmem:[%s811_s3 + $0xa8] sm:$0xff] %v322_v30  ;;  %430 = vst [vmem:[%s811_s3 + $0xb8] sm:$0xff] %v395_v31 }
 0x10d   :  { %v325_v32 = vpop.f32.mrb[12].mxu0  ;;  %v398_v33 = vpop.f32.mrb[12].mxu1 }
 0x10e   :  { %v326_v34 = vadd.f32 %v325_v32, %v672_v44  ;;  %v399_v35 = vadd.f32 %v398_v33, %v674_v45  ;;  %v327_v36 = vpop.f32.mrb[13].mxu0  ;;  %v400_v37 = vpop.f32.mrb[13].mxu1 }
 0x10f   :  { %v328_v38 = vadd.f32 %v327_v36, %v676_v46  ;;  %v401_v39 = vadd.f32 %v400_v37, %v678_v47  ;;  %v329_v40 = vpop.f32.mrb[14].mxu0  ;;  %v402_v41 = vpop.f32.mrb[14].mxu1 }
 0x110   :  { %431 = vst [vmem:[%s811_s3 + $0xc0] sm:$0xff] %v326_v34  ;;  %433 = vst [vmem:[%s811_s3 + $0xd0] sm:$0xff] %v399_v35  ;;  %v330_v42 = vadd.f32 %v329_v40, %v672_v44  ;;  %v403_v43 = vadd.f32 %v402_v41, %v674_v45  ;;  %v331_v48 = vpop.f32.mrb[15].mxu0  ;;  %v404_v49 = vpop.f32.mrb[15].mxu1 }
 0x111   :  { %432 = vst [vmem:[%s811_s3 + $0xc8] sm:$0xff] %v328_v38  ;;  %434 = vst [vmem:[%s811_s3 + $0xd8] sm:$0xff] %v401_v39  ;;  %v332_v50 = vadd.f32 %v331_v48, %v676_v46  ;;  %v405_v51 = vadd.f32 %v404_v49, %v678_v47 }
 0x112   :  { %435 = vst [vmem:[%s811_s3 + $0xe0] sm:$0xff] %v330_v42  ;;  %437 = vst [vmem:[%s811_s3 + $0xf0] sm:$0xff] %v403_v43 }
 0x113   :  { %436 = vst [vmem:[%s811_s3 + $0xe8] sm:$0xff] %v332_v50  ;;  %438 = vst [vmem:[%s811_s3 + $0xf8] sm:$0xff] %v405_v51 }

// kernel: lstm_seq_model_apply.5
= control target key start
LH: loop header
LB: loop body
LE: loop exit
PB: predicated region body
PF: predicated region fallthrough
CT: control target
= control target key end

     0   :  { %v353_v2 = vmov 0   ;;  %s452_s0 = inlined_call_operand.vmem [shape: bf16[64,128], index: 0, kind: input, shape index: {}]   ;;  %s453_s1 = inlined_call_operand.vmem [shape: bf16[128,256], index: 1, kind: input, shape index: {}]   ;;  %s454_s2 = inlined_call_operand.vmem [shape: f32[1,256], index: 2, kind: input, shape index: {}]   ;;  %s455_s3 = inlined_call_operand.hbm [shape: f32[64,256], index: 3, kind: output, shape index: {}]  }
   0x1   :  { %v301_v0 = vld [vmem:[%s453_s1 + $0x4] ss:$8 sps:$4 sm:$0xff]   ;;  %v303_v1 = vld [vmem:[%s453_s1] ss:$8 sps:$4 sm:$0xff]   ;;  %188 = vmatprep.mubr.bf16.mxu0 %v353_v2  ;;  %208 = vmatprep.mubr.bf16.mxu1 %v353_v2  ;;  %v304_v3 = vld [vmem:[%s453_s1 + $0x14] ss:$8 sps:$4 sm:$0xff]  }
   0x2   :  { %156 = vmatprep.subr.bf16.mxu0 %v301_v0  ;;  %281 = vmatprep.subr.bf16.mxu1 %v301_v0  ;;  %v306_v4 = vld [vmem:[%s453_s1 + $0x10] ss:$8 sps:$4 sm:$0xff]   ;;  %v307_v5 = vld [vmem:[%s453_s1 + $0x24] ss:$8 sps:$4 sm:$0xff]   ;;  %v309_v6 = vld [vmem:[%s453_s1 + $0x20] ss:$8 sps:$4 sm:$0xff]  }
   0x3   :  { %157 = vmatpush1.bf16.msra.mxu0 %v303_v1  ;;  %289 = vmatpush1.bf16.msra.mxu1 %v303_v1  ;;  %v310_v7 = vld [vmem:[%s453_s1 + $0x34] ss:$8 sps:$4 sm:$0xff]   ;;  %v312_v8 = vld [vmem:[%s453_s1 + $0x30] ss:$8 sps:$4 sm:$0xff]   ;;  %v313_v9 = vld [vmem:[%s453_s1 + $0x44] ss:$8 sps:$4 sm:$0xff]  }
   0x4   :  { %158 = vmatprep.subr.bf16.mxu0 %v304_v3  ;;  %282 = vmatprep.subr.bf16.mxu1 %v304_v3  ;;  %v315_v10 = vld [vmem:[%s453_s1 + $0x40] ss:$8 sps:$4 sm:$0xff]  }
   0x7   :  { %159 = vmatpush1.bf16.msra.mxu0 %v306_v4  ;;  %290 = vmatpush1.bf16.msra.mxu1 %v306_v4 }
   0x8   :  { %160 = vmatprep.subr.bf16.mxu0 %v307_v5  ;;  %283 = vmatprep.subr.bf16.mxu1 %v307_v5 }
   0xb   :  { %161 = vmatpush1.bf16.msra.mxu0 %v309_v6  ;;  %291 = vmatpush1.bf16.msra.mxu1 %v309_v6 }
   0xc   :  { %162 = vmatprep.subr.bf16.mxu0 %v310_v7  ;;  %284 = vmatprep.subr.bf16.mxu1 %v310_v7 }
   0xf   :  { %163 = vmatpush1.bf16.msra.mxu0 %v312_v8  ;;  %292 = vmatpush1.bf16.msra.mxu1 %v312_v8 }
  0x10   :  { %8 = vsyncpa [#allocation3], 0  ;;  %164 = vmatprep.subr.bf16.mxu0 %v313_v9  ;;  %285 = vmatprep.subr.bf16.mxu1 %v313_v9  ;;  %v316_v11 = vld [vmem:[%s453_s1 + $0x54] ss:$8 sps:$4 sm:$0xff]   ;;  %v318_v12 = vld [vmem:[%s453_s1 + $0x50] ss:$8 sps:$4 sm:$0xff]   ;;  %v42_v21 = vlaneseq }
  0x11   :  { %v319_v13 = vld [vmem:[%s453_s1 + $0x64] ss:$8 sps:$4 sm:$0xff]   ;;  %v321_v14 = vld [vmem:[%s453_s1 + $0x60] ss:$8 sps:$4 sm:$0xff]   ;;  %v322_v15 = vld [vmem:[%s453_s1 + $0x74] ss:$8 sps:$4 sm:$0xff]  }
  0x12   :  { %v324_v16 = vld [vmem:[%s453_s1 + $0x70] ss:$8 sps:$4 sm:$0xff]   ;;  %v325_v17 = vld [vmem:[%s452_s0] sm:$0xff]   ;;  %v327_v19 = vld [vmem:[%s452_s0 + $0x8] sm:$0xff]   ;;  %v43_v22 = vshrl.u32 %v42_v21, 7 }
  0x13   :  { %165 = vmatpush1.bf16.msra.mxu0 %v315_v10  ;;  %293 = vmatpush1.bf16.msra.mxu1 %v315_v10  ;;  %v326_v18 = vld [vmem:[%s452_s0 + $0x10] sm:$0xff]   ;;  %v328_v20 = vld [vmem:[%s452_s0 + $0x18] sm:$0xff]   ;;  %v40_v24 = vld [vmem:[%s454_s2] sm:$0x3]  ;;  %s354_s0 = smov [#allocation2]  }
  0x14   :  { %166 = vmatprep.subr.bf16.mxu0 %v316_v11  ;;  %286 = vmatprep.subr.bf16.mxu1 %v316_v11  ;;  %v44_v23 = vsub.s32 0, %v43_v22  ;;  %v48_v25 = vsub.s32 1, %v43_v22  ;;  %s250_s2 = sshll.u32 %s354_s0, 4  ;;  %s251_s2 = int_to_ptr.vmem [resolvable:$true] %s250_s2 }
  0x15   :  { %s329_s26 = scalar_lea.vmem %s251_s2, 2048  ;;  %p334_p1 = scmp.lt.s32.totalorder %s251_s2, %s251_s2 }
  0x16   :  { %v45_v26 = vrot.slane %v40_v24, %v44_v23  ;;  %v49_v27 = vrot.slane %v40_v24, %v48_v25  ;;  %p330_p0 = scmp.ne.s32.totalorder %s251_s2, %s329_s26  ;;  %p335_p2 = scmp.lt.s32.totalorder %s329_s26, %s329_s26 }
  0x17   :  { %167 = vmatpush1.bf16.msra.mxu0 %v318_v12  ;;  %294 = vmatpush1.bf16.msra.mxu1 %v318_v12 }
  0x18   :  { %168 = vmatprep.subr.bf16.mxu0 %v319_v13  ;;  %287 = vmatprep.subr.bf16.mxu1 %v319_v13  ;;  %p336_p3 = por %p335_p2, %p334_p1 }
  0x1a   :  { %p337_p4 = pnand %p336_p3, %p330_p0 }
  0x1b   :  { %169 = vmatpush1.bf16.msra.mxu0 %v321_v14  ;;  %295 = vmatpush1.bf16.msra.mxu1 %v321_v14 }
  0x1c   :  { %170 = vmatprep.subr.bf16.mxu0 %v322_v15  ;;  %288 = vmatprep.subr.bf16.mxu1 %v322_v15 }
  0x1f   :  { %171 = vmatpush1.bf16.msra.mxu0 %v324_v16  ;;  %296 = vmatpush1.bf16.msra.mxu1 %v324_v16 }
  0x22   :  { %189 = vmatmul.mubr.bf16.vlgmr.msra.gmra.mrb[0].mxu0 %v325_v17  ;;  %209 = vmatmul.mubr.bf16.vlgmr.msra.gmra.mrb[0].mxu1 %v326_v18 }
  0x23   :  { %198 = vmatprep.mubr.bf16.mxu0 %v353_v2  ;;  %218 = vmatprep.mubr.bf16.mxu1 %v353_v2 }
  0x2a   :  { %199 = vmatmul.mubr.bf16.gmra.mrb[4].mxu0 %v327_v19  ;;  %219 = vmatmul.mubr.bf16.gmra.mrb[4].mxu1 %v328_v20 }
  0xf5   :  { %v190_v28 = vpop.f32.mrb[0].mxu0  ;;  %v210_v29 = vpop.f32.mrb[0].mxu1 }
  0xf6   :  { %v191_v30 = vadd.f32 %v190_v28, %v45_v26  ;;  %v211_v31 = vadd.f32 %v210_v29, %v45_v26  ;;  %v192_v32 = vpop.f32.mrb[1].mxu0  ;;  %v212_v33 = vpop.f32.mrb[1].mxu1 }
  0xf7   :  { %v193_v34 = vadd.f32 %v192_v32, %v49_v27  ;;  %v213_v35 = vadd.f32 %v212_v33, %v49_v27  ;;  %v194_v36 = vpop.f32.mrb[2].mxu0  ;;  %v214_v37 = vpop.f32.mrb[2].mxu1 }
  0xf8   :  { %229 = vst [vmem:[#allocation2] sm:$0xff] %v191_v30  ;;  %237 = vst [vmem:[#allocation2 + $0x40] sm:$0xff] %v211_v31  ;;  %v195_v38 = vadd.f32 %v194_v36, %v45_v26  ;;  %v215_v39 = vadd.f32 %v214_v37, %v45_v26  ;;  %v196_v40 = vpop.f32.mrb[3].mxu0  ;;  %v216_v41 = vpop.f32.mrb[3].mxu1 }
  0xf9   :  { %230 = vst [vmem:[#allocation2 + $0x8] sm:$0xff] %v193_v34  ;;  %238 = vst [vmem:[#allocation2 + $0x48] sm:$0xff] %v213_v35  ;;  %v197_v42 = vadd.f32 %v196_v40, %v49_v27  ;;  %v217_v43 = vadd.f32 %v216_v41, %v49_v27 }
  0xfa   :  { %231 = vst [vmem:[#allocation2 + $0x10] sm:$0xff] %v195_v38  ;;  %239 = vst [vmem:[#allocation2 + $0x50] sm:$0xff] %v215_v39 }
  0xfb   :  { %232 = vst [vmem:[#allocation2 + $0x18] sm:$0xff] %v197_v42  ;;  %240 = vst [vmem:[#allocation2 + $0x58] sm:$0xff] %v217_v43 }
  0xfd   :  { %v200_v44 = vpop.f32.mrb[4].mxu0  ;;  %v220_v45 = vpop.f32.mrb[4].mxu1 }
  0xfe   :  { %v201_v46 = vadd.f32 %v200_v44, %v45_v26  ;;  %v221_v47 = vadd.f32 %v220_v45, %v45_v26  ;;  %v202_v48 = vpop.f32.mrb[5].mxu0  ;;  %v222_v49 = vpop.f32.mrb[5].mxu1 }
  0xff   :  { %v203_v50 = vadd.f32 %v202_v48, %v49_v27  ;;  %v223_v51 = vadd.f32 %v222_v49, %v49_v27  ;;  %v204_v52 = vpop.f32.mrb[6].mxu0  ;;  %v224_v53 = vpop.f32.mrb[6].mxu1 }
 0x100   :  { %233 = vst [vmem:[#allocation2 + $0x20] sm:$0xff] %v201_v46  ;;  %241 = vst [vmem:[#allocation2 + $0x60] sm:$0xff] %v221_v47  ;;  %v205_v54 = vadd.f32 %v204_v52, %v45_v26  ;;  %v225_v55 = vadd.f32 %v224_v53, %v45_v26  ;;  %v206_v56 = vpop.f32.mrb[7].mxu0  ;;  %v226_v57 = vpop.f32.mrb[7].mxu1 }
 0x101   :  { %234 = vst [vmem:[#allocation2 + $0x28] sm:$0xff] %v203_v50  ;;  %242 = vst [vmem:[#allocation2 + $0x68] sm:$0xff] %v223_v51  ;;  %v207_v58 = vadd.f32 %v206_v56, %v49_v27  ;;  %v227_v59 = vadd.f32 %v226_v57, %v49_v27 }
 0x102   :  { %235 = vst [vmem:[#allocation2 + $0x30] sm:$0xff] %v205_v54  ;;  %243 = vst [vmem:[#allocation2 + $0x70] sm:$0xff] %v225_v55 }
 0x103   :  { %236 = vst [vmem:[#allocation2 + $0x38] sm:$0xff] %v207_v58  ;;  %244 = vst [vmem:[#allocation2 + $0x78] sm:$0xff] %v227_v59 }
 0x104   :  { %340 = shalt.err (!%p337_p4)
}
 0x105   :  { %s341_s29 = scalar_lea.hbm %s455_s3, 2048 }
 0x106   :  { %p342_p5 = scmp.ne.s32.totalorder %s455_s3, %s341_s29  ;;  %p345_p6 = scmp.lt.u32.totalorder %s341_s29, %s455_s3 }
 0x108   :  { %p347_p7 = pnand %p345_p6, %p342_p5 }
 0x10a   :  { %350 = shalt.err (!%p347_p7)
}
 0x10b   :  { %s355_s7 = smov 256   ;;  %s356_s8 = smov 16  }
 0x10c   :  { %256 = dma.vmem_to_hbm [thread:$0]  %s251_s2, 2048, %s455_s3, [#allocation3], %s355_s7, %s355_s7, %s356_s8  }
 0x10d   :  { %351 = dma.done.wait [#allocation3], 2048  }
 0x10e   :  { %352 = vsyncadd [#allocation3], 4294965248 }
 0x10f   :  { %260 = vsyncpa [#allocation3], 1 }

// kernel: lstm_seq_model_apply.4
= control target key start
LH: loop header
LB: loop body
LE: loop exit
PB: predicated region body
PF: predicated region fallthrough
CT: control target
= control target key end

     0   :  { %s2464_s0 = inlined_call_operand.vmem [shape: f32[8,8,512], index: 0, kind: input, shape index: {}]   ;;  %s2465_s1 = inlined_call_operand.vmem [shape: bf16[128,512], index: 1, kind: input, shape index: {}]   ;;  %s2466_s2 = inlined_call_operand.vmem [shape: bf16[8,8,128], index: 2, kind: output, shape index: {}]  }
   0x1   :  { %v31_v0 = vld [vmem:[%s2465_s1] sm:$0xf]  ;;  %v33_v1 = vld [vmem:[%s2465_s1 + $0x10] sm:$0xf]  ;;  %v35_v2 = vld [vmem:[%s2465_s1 + $0x4] sm:$0xf] }
   0x2   :  { %32 = vst [vmem:[#allocation2] sm:$0xf] %v31_v0  ;;  %34 = vst [vmem:[#allocation2 + $0x4] sm:$0xf] %v33_v1  ;;  %v37_v3 = vld [vmem:[%s2465_s1 + $0x14] sm:$0xf] }
   0x3   :  { %36 = vst [vmem:[#allocation2 + $0x8] sm:$0xf] %v35_v2  ;;  %v39_v4 = vld [vmem:[%s2465_s1 + $0x8] sm:$0xf]  ;;  %v41_v5 = vld [vmem:[%s2465_s1 + $0x18] sm:$0xf] }
   0x4   :  { %38 = vst [vmem:[#allocation2 + $0xc] sm:$0xf] %v37_v3  ;;  %40 = vst [vmem:[#allocation2 + $0x10] sm:$0xf] %v39_v4  ;;  %v43_v6 = vld [vmem:[%s2465_s1 + $0xc] sm:$0xf] }
   0x5   :  { %42 = vst [vmem:[#allocation2 + $0x14] sm:$0xf] %v41_v5  ;;  %v45_v7 = vld [vmem:[%s2465_s1 + $0x1c] sm:$0xff]   ;;  %v49_v8 = vld [vmem:[%s2465_s1 + $0x30] sm:$0xf] }
   0x6   :  { %44 = vst [vmem:[#allocation2 + $0x18] sm:$0xf] %v43_v6  ;;  %46 = vst [vmem:[#allocation2 + $0x1c] sm:$0xff] %v45_v7   ;;  %v51_v9 = vld [vmem:[%s2465_s1 + $0x24] sm:$0xf]  ;;  %v61_v14 = vld [vmem:[%s2465_s1 + $0x3c] sm:$0xff]  }
   0x7   :  { %50 = vst [vmem:[#allocation2 + $0x24] sm:$0xf] %v49_v8  ;;  %v53_v10 = vld [vmem:[%s2465_s1 + $0x34] sm:$0xf]  ;;  %v55_v11 = vld [vmem:[%s2465_s1 + $0x28] sm:$0xf] }
   0x8   :  { %52 = vst [vmem:[#allocation2 + $0x28] sm:$0xf] %v51_v9  ;;  %54 = vst [vmem:[#allocation2 + $0x2c] sm:$0xf] %v53_v10  ;;  %v57_v12 = vld [vmem:[%s2465_s1 + $0x38] sm:$0xf] }
   0x9   :  { %56 = vst [vmem:[#allocation2 + $0x30] sm:$0xf] %v55_v11  ;;  %v59_v13 = vld [vmem:[%s2465_s1 + $0x2c] sm:$0xf]  ;;  %58 = vst [vmem:[#allocation2 + $0x34] sm:$0xf] %v57_v12 }
   0xa   :  { %60 = vst [vmem:[#allocation2 + $0x38] sm:$0xf] %v59_v13  ;;  %62 = vst [vmem:[#allocation2 + $0x3c] sm:$0xff] %v61_v14   ;;  %v65_v15 = vld [vmem:[%s2465_s1 + $0x50] sm:$0xf]  ;;  %v77_v21 = vld [vmem:[%s2465_s1 + $0x5c] sm:$0xff]  }
   0xb   :  { %v67_v16 = vld [vmem:[%s2465_s1 + $0x44] sm:$0xf]  ;;  %v69_v17 = vld [vmem:[%s2465_s1 + $0x54] sm:$0xf]  ;;  %66 = vst [vmem:[#allocation2 + $0x44] sm:$0xf] %v65_v15 }
   0xc   :  { %68 = vst [vmem:[#allocation2 + $0x48] sm:$0xf] %v67_v16  ;;  %70 = vst [vmem:[#allocation2 + $0x4c] sm:$0xf] %v69_v17  ;;  %v71_v18 = vld [vmem:[%s2465_s1 + $0x48] sm:$0xf] }
   0xd   :  { %v73_v19 = vld [vmem:[%s2465_s1 + $0x58] sm:$0xf]  ;;  %v75_v20 = vld [vmem:[%s2465_s1 + $0x4c] sm:$0xf]  ;;  %72 = vst [vmem:[#allocation2 + $0x50] sm:$0xf] %v71_v18 }
   0xe   :  { %74 = vst [vmem:[#allocation2 + $0x54] sm:$0xf] %v73_v19  ;;  %76 = vst [vmem:[#allocation2 + $0x58] sm:$0xf] %v75_v20  ;;  %v81_v22 = vld [vmem:[%s2465_s1 + $0x70] sm:$0xf] }
   0xf   :  { %v83_v23 = vld [vmem:[%s2465_s1 + $0x64] sm:$0xf]  ;;  %78 = vst [vmem:[#allocation2 + $0x5c] sm:$0xff] %v77_v21   ;;  %82 = vst [vmem:[#allocation2 + $0x64] sm:$0xf] %v81_v22  ;;  %v93_v28 = vld [vmem:[%s2465_s1 + $0x7c] sm:$0xff]  }
  0x10   :  { %84 = vst [vmem:[#allocation2 + $0x68] sm:$0xf] %v83_v23  ;;  %v85_v24 = vld [vmem:[%s2465_s1 + $0x74] sm:$0xf]  ;;  %v87_v25 = vld [vmem:[%s2465_s1 + $0x68] sm:$0xf] }
  0x11   :  { %v89_v26 = vld [vmem:[%s2465_s1 + $0x78] sm:$0xf]  ;;  %86 = vst [vmem:[#allocation2 + $0x6c] sm:$0xf] %v85_v24  ;;  %88 = vst [vmem:[#allocation2 + $0x70] sm:$0xf] %v87_v25 }
  0x12   :  { %90 = vst [vmem:[#allocation2 + $0x74] sm:$0xf] %v89_v26  ;;  %v91_v27 = vld [vmem:[%s2465_s1 + $0x6c] sm:$0xf]  ;;  %v97_v29 = vld [vmem:[%s2465_s1 + $0x90] sm:$0xf] }
  0x13   :  { %92 = vst [vmem:[#allocation2 + $0x78] sm:$0xf] %v91_v27  ;;  %94 = vst [vmem:[#allocation2 + $0x7c] sm:$0xff] %v93_v28   ;;  %v99_v30 = vld [vmem:[%s2465_s1 + $0x84] sm:$0xf]  ;;  %v109_v35 = vld [vmem:[%s2465_s1 + $0x9c] sm:$0xff]  }
  0x14   :  { %98 = vst [vmem:[#allocation2 + $0x84] sm:$0xf] %v97_v29  ;;  %v101_v31 = vld [vmem:[%s2465_s1 + $0x94] sm:$0xf]  ;;  %v103_v32 = vld [vmem:[%s2465_s1 + $0x88] sm:$0xf] }
  0x15   :  { %100 = vst [vmem:[#allocation2 + $0x88] sm:$0xf] %v99_v30  ;;  %102 = vst [vmem:[#allocation2 + $0x8c] sm:$0xf] %v101_v31  ;;  %v105_v33 = vld [vmem:[%s2465_s1 + $0x98] sm:$0xf] }
  0x16   :  { %104 = vst [vmem:[#allocation2 + $0x90] sm:$0xf] %v103_v32  ;;  %v107_v34 = vld [vmem:[%s2465_s1 + $0x8c] sm:$0xf]  ;;  %106 = vst [vmem:[#allocation2 + $0x94] sm:$0xf] %v105_v33 }
  0x17   :  { %108 = vst [vmem:[#allocation2 + $0x98] sm:$0xf] %v107_v34  ;;  %110 = vst [vmem:[#allocation2 + $0x9c] sm:$0xff] %v109_v35   ;;  %v113_v36 = vld [vmem:[%s2465_s1 + $0xb0] sm:$0xf]  ;;  %v125_v42 = vld [vmem:[%s2465_s1 + $0xbc] sm:$0xff]  }
  0x18   :  { %v115_v37 = vld [vmem:[%s2465_s1 + $0xa4] sm:$0xf]  ;;  %v117_v38 = vld [vmem:[%s2465_s1 + $0xb4] sm:$0xf]  ;;  %114 = vst [vmem:[#allocation2 + $0xa4] sm:$0xf] %v113_v36 }
  0x19   :  { %116 = vst [vmem:[#allocation2 + $0xa8] sm:$0xf] %v115_v37  ;;  %118 = vst [vmem:[#allocation2 + $0xac] sm:$0xf] %v117_v38  ;;  %v119_v39 = vld [vmem:[%s2465_s1 + $0xa8] sm:$0xf] }
  0x1a   :  { %v121_v40 = vld [vmem:[%s2465_s1 + $0xb8] sm:$0xf]  ;;  %v123_v41 = vld [vmem:[%s2465_s1 + $0xac] sm:$0xf]  ;;  %120 = vst [vmem:[#allocation2 + $0xb0] sm:$0xf] %v119_v39 }
  0x1b   :  { %122 = vst [vmem:[#allocation2 + $0xb4] sm:$0xf] %v121_v40  ;;  %124 = vst [vmem:[#allocation2 + $0xb8] sm:$0xf] %v123_v41  ;;  %v129_v43 = vld [vmem:[%s2465_s1 + $0xd0] sm:$0xf] }
  0x1c   :  { %v131_v44 = vld [vmem:[%s2465_s1 + $0xc4] sm:$0xf]  ;;  %126 = vst [vmem:[#allocation2 + $0xbc] sm:$0xff] %v125_v42   ;;  %130 = vst [vmem:[#allocation2 + $0xc4] sm:$0xf] %v129_v43  ;;  %v141_v49 = vld [vmem:[%s2465_s1 + $0xdc] sm:$0xff]  }
  0x1d   :  { %132 = vst [vmem:[#allocation2 + $0xc8] sm:$0xf] %v131_v44  ;;  %v133_v45 = vld [vmem:[%s2465_s1 + $0xd4] sm:$0xf]  ;;  %v135_v46 = vld [vmem:[%s2465_s1 + $0xc8] sm:$0xf] }
  0x1e   :  { %v137_v47 = vld [vmem:[%s2465_s1 + $0xd8] sm:$0xf]  ;;  %134 = vst [vmem:[#allocation2 + $0xcc] sm:$0xf] %v133_v45  ;;  %136 = vst [vmem:[#allocation2 + $0xd0] sm:$0xf] %v135_v46 }
  0x1f   :  { %138 = vst [vmem:[#allocation2 + $0xd4] sm:$0xf] %v137_v47  ;;  %v139_v48 = vld [vmem:[%s2465_s1 + $0xcc] sm:$0xf]  ;;  %v145_v50 = vld [vmem:[%s2465_s1 + $0xf0] sm:$0xf] }
  0x20   :  { %140 = vst [vmem:[#allocation2 + $0xd8] sm:$0xf] %v139_v48  ;;  %142 = vst [vmem:[#allocation2 + $0xdc] sm:$0xff] %v141_v49   ;;  %v147_v51 = vld [vmem:[%s2465_s1 + $0xe4] sm:$0xf] }
  0x21   :  { %146 = vst [vmem:[#allocation2 + $0xe4] sm:$0xf] %v145_v50  ;;  %v149_v52 = vld [vmem:[%s2465_s1 + $0xf4] sm:$0xf]  ;;  %v151_v53 = vld [vmem:[%s2465_s1 + $0xe8] sm:$0xf] }
  0x22   :  { %148 = vst [vmem:[#allocation2 + $0xe8] sm:$0xf] %v147_v51  ;;  %150 = vst [vmem:[#allocation2 + $0xec] sm:$0xf] %v149_v52  ;;  %v153_v54 = vld [vmem:[%s2465_s1 + $0xf8] sm:$0xf] }
  0x23   :  { %152 = vst [vmem:[#allocation2 + $0xf0] sm:$0xf] %v151_v53  ;;  %v155_v55 = vld [vmem:[%s2465_s1 + $0xec] sm:$0xf]  ;;  %v157_v56 = vld [vmem:[%s2465_s1 + $0xfc] sm:$0xf] }
  0x24   :  { %154 = vst [vmem:[#allocation2 + $0xf4] sm:$0xf] %v153_v54  ;;  %156 = vst [vmem:[#allocation2 + $0xf8] sm:$0xf] %v155_v55 }
  0x25   :  { %158 = vst [vmem:[#allocation2 + $0xfc] sm:$0xf] %v157_v56 }
  0x26   :  { %317 = vsyncadd [#allocation5], 4096 }
  0x27   :  { %1734 = dma.done.wait [#allocation5], 4096 }
  0x28   :  { %1735 = vsyncadd [#allocation5], 4294963200  ;;  %v1924_v57 = vld [vmem:[#allocation2 + $0x8] sm:$0xff]  ;;  %v1926_v58 = vld [vmem:[#allocation2] sm:$0xff]  ;;  %v1736_v60 = vmov 0   ;;  %v1737_v26 = vmov 0.0|0.0  }
  0x29   :  { %v1928_v59 = vld [vmem:[#allocation2 + $0x28] sm:$0xff]  ;;  %363 = vmatprep.subr.bf16.mxu0 %v1924_v57  ;;  %395 = vmatprep.mubr.bf16.mxu0 %v1736_v60  ;;  %v1933_v61 = vld [vmem:[#allocation2 + $0x18] sm:$0xff]  ;;  %v1937_v62 = vld [vmem:[#allocation2 + $0x20] sm:$0xff] }
  0x2a   :  { %364 = vmatpush1.bf16.msra.mxu0 %v1926_v58  ;;  %436 = vmatprep.mubr.bf16.mxu1 %v1736_v60  ;;  %v1940_v63 = vld [vmem:[#allocation2 + $0x10] sm:$0xff]  ;;  %v1942_v0 = vld [vmem:[#allocation2 + $0x38] sm:$0xff]  ;;  %v1944_v1 = vld [vmem:[#allocation2 + $0x48] sm:$0xff] }
  0x2b   :  { %365 = vmatprep.subr.bf16.mxu0 %v1928_v59  ;;  %404 = vmatprep.subr.bf16.mxu1 %v1933_v61  ;;  %v1948_v2 = vld [vmem:[#allocation2 + $0x30] sm:$0xff]  ;;  %v1951_v3 = vld [vmem:[#allocation2 + $0x58] sm:$0xff]  ;;  %v1954_v4 = vld [vmem:[#allocation2 + $0x40] sm:$0xff] }
  0x2c   :  { %405 = vmatpush1.bf16.msra.mxu1 %v1940_v63  ;;  %v1956_v5 = vld [vmem:[#allocation2 + $0x68] sm:$0xff]  ;;  %v1960_v6 = vld [vmem:[#allocation2 + $0x50] sm:$0xff]  ;;  %v1963_v7 = vld [vmem:[#allocation2 + $0x78] sm:$0xff] }
  0x2d   :  { %406 = vmatprep.subr.bf16.mxu1 %v1942_v0  ;;  %v1966_v8 = vld [vmem:[#allocation2 + $0x60] sm:$0xff]  ;;  %v1968_v9 = vld [vmem:[#allocation2 + $0x88] sm:$0xff]  ;;  %v1972_v10 = vld [vmem:[#allocation2 + $0x70] sm:$0xff] }
  0x2e   :  { %366 = vmatpush1.bf16.msra.mxu0 %v1937_v62  ;;  %v1975_v11 = vld [vmem:[#allocation2 + $0x98] sm:$0xff]  ;;  %v1978_v12 = vld [vmem:[#allocation2 + $0x80] sm:$0xff]  ;;  %v1980_v13 = vld [vmem:[#allocation2 + $0xa8] sm:$0xff] }
  0x2f   :  { %367 = vmatprep.subr.bf16.mxu0 %v1944_v1  ;;  %v1984_v14 = vld [vmem:[#allocation2 + $0x90] sm:$0xff]  ;;  %v1987_v15 = vld [vmem:[#allocation2 + $0xb8] sm:$0xff]  ;;  %v1990_v16 = vld [vmem:[#allocation2 + $0xa0] sm:$0xff] }
  0x30   :  { %407 = vmatpush1.bf16.msra.mxu1 %v1948_v2  ;;  %v1992_v17 = vld [vmem:[#allocation2 + $0xc8] sm:$0xff]  ;;  %v1996_v18 = vld [vmem:[#allocation2 + $0xb0] sm:$0xff]  ;;  %v1999_v19 = vld [vmem:[#allocation2 + $0xd8] sm:$0xff] }
  0x31   :  { %408 = vmatprep.subr.bf16.mxu1 %v1951_v3  ;;  %v2002_v20 = vld [vmem:[#allocation2 + $0xc0] sm:$0xff]  ;;  %v2004_v21 = vld [vmem:[#allocation2 + $0xe8] sm:$0xff]  ;;  %v2008_v22 = vld [vmem:[#allocation2 + $0xd0] sm:$0xff] }
  0x32   :  { %368 = vmatpush1.bf16.msra.mxu0 %v1954_v4  ;;  %v2011_v23 = vld [vmem:[#allocation2 + $0xf8] sm:$0xff]  ;;  %v2014_v24 = vld [vmem:[#allocation2 + $0xe0] sm:$0xff]  ;;  %v2018_v25 = vld [vmem:[#allocation2 + $0xf0] sm:$0xff] }
  0x33   :  { %369 = vmatprep.subr.bf16.mxu0 %v1956_v5  ;;  %v326_v27 = vld [vmem:[%s2464_s0] sm:$0xff]  ;;  %v327_v28 = vld [vmem:[%s2464_s0 + $0x8] sm:$0xff]  ;;  %v329_v39 = vld [vmem:[%s2464_s0 + $0x18] sm:$0xff] }
  0x34   :  { %409 = vmatpush1.bf16.msra.mxu1 %v1960_v6  ;;  %v328_v43 = vld [vmem:[%s2464_s0 + $0x10] sm:$0xff] }
  0x35   :  { %410 = vmatprep.subr.bf16.mxu1 %v1963_v7 }
  0x36   :  { %370 = vmatpush1.bf16.msra.mxu0 %v1966_v8 }
  0x37   :  { %371 = vmatprep.subr.bf16.mxu0 %v1968_v9 }
  0x38   :  { %411 = vmatpush1.bf16.msra.mxu1 %v1972_v10 }
  0x39   :  { %412 = vmatprep.subr.bf16.mxu1 %v1975_v11 }
  0x3a   :  { %372 = vmatpush1.bf16.msra.mxu0 %v1978_v12 }
  0x3b   :  { %373 = vmatprep.subr.bf16.mxu0 %v1980_v13 }
  0x3c   :  { %413 = vmatpush1.bf16.msra.mxu1 %v1984_v14 }
  0x3d   :  { %414 = vmatprep.subr.bf16.mxu1 %v1987_v15 }
  0x3e   :  { %374 = vmatpush1.bf16.msra.mxu0 %v1990_v16 }
  0x3f   :  { %375 = vmatprep.subr.bf16.mxu0 %v1992_v17 }
  0x40   :  { %415 = vmatpush1.bf16.msra.mxu1 %v1996_v18 }
  0x41   :  { %416 = vmatprep.subr.bf16.mxu1 %v1999_v19 }
  0x42   :  { %376 = vmatpush1.bf16.msra.mxu0 %v2002_v20 }
  0x43   :  { %377 = vmatprep.subr.bf16.mxu0 %v2004_v21 }
  0x44   :  { %417 = vmatpush1.bf16.msra.mxu1 %v2008_v22 }
  0x45   :  { %418 = vmatprep.subr.bf16.mxu1 %v2011_v23 }
  0x46   :  { %378 = vmatpush1.bf16.msra.mxu0 %v2014_v24 }
  0x47   :  { %512 = vmatprep.subr.bf16.mxu0 %v1924_v57 }
  0x48   :  { %419 = vmatpush1.bf16.msra.mxu1 %v2018_v25 }
  0x49   :  { %396 = vmatmul.mubr.bf16.vlgmr.msra.gmra.mrb[0].mxu0 %v1737_v26  ;;  %553 = vmatprep.subr.bf16.mxu1 %v1933_v61 }
  0x4a   :  { %513 = vmatpush1.bf16.msra.mxu0 %v1926_v58  ;;  %544 = vmatprep.mubr.bf16.mxu0 %v1736_v60 }
  0x4b   :  { %437 = vmatmul.mubr.bf16.vlgmr.msra.gmra.mrb[0].mxu1 %v1737_v26  ;;  %514 = vmatprep.subr.bf16.mxu0 %v1928_v59 }
  0x4c   :  { %554 = vmatpush1.bf16.msra.mxu1 %v1940_v63  ;;  %585 = vmatprep.mubr.bf16.mxu1 %v1736_v60 }
  0x4d   :  { %555 = vmatprep.subr.bf16.mxu1 %v1942_v0 }
  0x4e   :  { %515 = vmatpush1.bf16.msra.mxu0 %v1937_v62 }
  0x4f   :  { %516 = vmatprep.subr.bf16.mxu0 %v1944_v1 }
  0x50   :  { %556 = vmatpush1.bf16.msra.mxu1 %v1948_v2 }
  0x51   :  { %557 = vmatprep.subr.bf16.mxu1 %v1951_v3 }
  0x52   :  { %517 = vmatpush1.bf16.msra.mxu0 %v1954_v4 }
  0x53   :  { %518 = vmatprep.subr.bf16.mxu0 %v1956_v5 }
  0x54   :  { %558 = vmatpush1.bf16.msra.mxu1 %v1960_v6 }
  0x55   :  { %559 = vmatprep.subr.bf16.mxu1 %v1963_v7 }
  0x56   :  { %519 = vmatpush1.bf16.msra.mxu0 %v1966_v8 }
  0x57   :  { %520 = vmatprep.subr.bf16.mxu0 %v1968_v9 }
  0x58   :  { %560 = vmatpush1.bf16.msra.mxu1 %v1972_v10 }
  0x59   :  { %561 = vmatprep.subr.bf16.mxu1 %v1975_v11 }
  0x5a   :  { %521 = vmatpush1.bf16.msra.mxu0 %v1978_v12 }
  0x5b   :  { %522 = vmatprep.subr.bf16.mxu0 %v1980_v13 }
  0x5c   :  { %562 = vmatpush1.bf16.msra.mxu1 %v1984_v14 }
  0x5d   :  { %563 = vmatprep.subr.bf16.mxu1 %v1987_v15 }
  0x5e   :  { %523 = vmatpush1.bf16.msra.mxu0 %v1990_v16 }
  0x5f   :  { %524 = vmatprep.subr.bf16.mxu0 %v1992_v17 }
  0x60   :  { %564 = vmatpush1.bf16.msra.mxu1 %v1996_v18 }
  0x61   :  { %565 = vmatprep.subr.bf16.mxu1 %v1999_v19 }
  0x62   :  { %525 = vmatpush1.bf16.msra.mxu0 %v2002_v20 }
  0x63   :  { %526 = vmatprep.subr.bf16.mxu0 %v2004_v21 }
  0x64   :  { %566 = vmatpush1.bf16.msra.mxu1 %v2008_v22 }
  0x65   :  { %567 = vmatprep.subr.bf16.mxu1 %v2011_v23 }
  0x66   :  { %527 = vmatpush1.bf16.msra.mxu0 %v2014_v24 }
  0x67   :  { %662 = vmatprep.subr.bf16.mxu0 %v1924_v57 }
  0x68   :  { %568 = vmatpush1.bf16.msra.mxu1 %v2018_v25 }
  0x69   :  { %703 = vmatprep.subr.bf16.mxu1 %v1933_v61 }
 0x11c   :  { %v397_v29 = vpop.f32.mrb[0].mxu0 }
 0x11d   :  { %v445_v30 = vadd.f32 %v397_v29, %v326_v27  ;;  %v399_v31 = vpop.f32.mrb[1].mxu0 }
 0x11e   :  { %v446_v32 = vadd.f32 %v399_v31, %v327_v28  ;;  %v401_v33 = vpop.f32.mrb[2].mxu0  ;;  %v438_v34 = vpop.f32.mrb[0].mxu1  ;;  %v1548_v31 = vld [vmem:[%s2464_s0 + $0x20] sm:$0xff] }
 0x11f   :  { %v1545_v35 = vmul.f32 -1.442695, %v445_v30  ;;  %v402_v36 = vpop.f32.mrb[3].mxu0  ;;  %v440_v37 = vpop.f32.mrb[1].mxu1  ;;  %v447_v45 = vadd.f32 %v438_v34, %v328_v43 }
 0x120   :  { %v1546_v38 = vmul.f32 -1.442695, %v446_v32  ;;  %v442_v40 = vpop.f32.mrb[2].mxu1  ;;  %v448_v42 = vadd.f32 %v440_v37, %v329_v39  ;;  %v1549_v32 = vld [vmem:[%s2464_s0 + $0x28] sm:$0xff] }
 0x121   :  { %1606 = vpow2.f32 %v1545_v35  ;;  %v443_v41 = vpop.f32.mrb[3].mxu1 }
 0x122   :  { %1608 = vpow2.f32 %v1546_v38  ;;  %v1547_v44 = vmul.f32 -1.442695, %v448_v42 }
 0x124   :  { %1610 = vpow2.f32 %v1547_v44 }
 0x125   :  { %1612 = vtanh.f32 %v447_v45  ;;  %v1551_v45 = vld [vmem:[%s2464_s0 + $0x38] sm:$0xff] }
 0x12b   :  { %v1607_v46 = vpop.eup %1606 }
 0x12c   :  { %v1609_v47 = vpop.eup %1608  ;;  %v452_v48 = vadd.f32 1.0, %v1607_v46 }
 0x12d   :  { %v458_v49 = vadd.f32 1.0, %v1609_v47  ;;  %v1550_v47 = vld [vmem:[%s2464_s0 + $0x30] sm:$0xff] }
 0x12e   :  { %1614 = vrcp.f32 %v452_v48  ;;  %v1611_v50 = vpop.eup %1610 }
 0x12f   :  { %1616 = vrcp.f32 %v458_v49  ;;  %v1613_v51 = vpop.eup %1612  ;;  %v465_v53 = vadd.f32 1.0, %v1611_v50 }
 0x131   :  { %1618 = vrcp.f32 %v465_v53 }
 0x138   :  { %v1615_v52 = vpop.eup %1614 }
 0x139   :  { %v1617_v54 = vpop.eup %1616  ;;  %v469_v55 = vmul.f32 %v1615_v52, %v1613_v51 }
 0x13a   :  { %v468_v56 = vmul.f32 0.0, %v1617_v54 }
 0x13b   :  { %v1619_v27 = vpop.eup %1618 }
 0x13c   :  { %v2070_v26 = vadd.f32 %v469_v55, %v468_v56 }
 0x13e   :  { %1620 = vtanh.f32 %v2070_v26 }
 0x148   :  { %v1621_v28 = vpop.eup %1620 }
 0x149   :  { %v472_v29 = vmul.f32 %v1621_v28, %v1619_v27 }
 0x14b   :  { %v473_v30 = vpack.c.bf16 %v472_v29, %v472_v29 }
 0x14d   :  { %474 = vst [vmem:[%s2466_s2] sm:$0xf] %v473_v30  ;;  %545 = vmatmul.mubr.bf16.vlgmr.msra.gmra.mrb[4].mxu0 %v473_v30  ;;  %586 = vmatmul.mubr.bf16.vlgmr.msra.gmra.mrb[4].mxu1 %v473_v30 }
 0x14e   :  { %663 = vmatpush1.bf16.msra.mxu0 %v1926_v58  ;;  %704 = vmatpush1.bf16.msra.mxu1 %v1940_v63 }
 0x14f   :  { %664 = vmatprep.subr.bf16.mxu0 %v1928_v59  ;;  %705 = vmatprep.subr.bf16.mxu1 %v1942_v0 }
 0x150   :  { %694 = vmatprep.mubr.bf16.mxu0 %v1736_v60  ;;  %735 = vmatprep.mubr.bf16.mxu1 %v1736_v60 }
 0x152   :  { %665 = vmatpush1.bf16.msra.mxu0 %v1937_v62  ;;  %706 = vmatpush1.bf16.msra.mxu1 %v1948_v2 }
 0x153   :  { %666 = vmatprep.subr.bf16.mxu0 %v1944_v1  ;;  %707 = vmatprep.subr.bf16.mxu1 %v1951_v3 }
 0x156   :  { %667 = vmatpush1.bf16.msra.mxu0 %v1954_v4  ;;  %708 = vmatpush1.bf16.msra.mxu1 %v1960_v6 }
 0x157   :  { %668 = vmatprep.subr.bf16.mxu0 %v1956_v5  ;;  %709 = vmatprep.subr.bf16.mxu1 %v1963_v7 }
 0x15a   :  { %669 = vmatpush1.bf16.msra.mxu0 %v1966_v8  ;;  %710 = vmatpush1.bf16.msra.mxu1 %v1972_v10 }
 0x15b   :  { %670 = vmatprep.subr.bf16.mxu0 %v1968_v9  ;;  %711 = vmatprep.subr.bf16.mxu1 %v1975_v11 }
 0x15e   :  { %671 = vmatpush1.bf16.msra.mxu0 %v1978_v12  ;;  %712 = vmatpush1.bf16.msra.mxu1 %v1984_v14 }
 0x15f   :  { %672 = vmatprep.subr.bf16.mxu0 %v1980_v13  ;;  %713 = vmatprep.subr.bf16.mxu1 %v1987_v15 }
 0x162   :  { %673 = vmatpush1.bf16.msra.mxu0 %v1990_v16  ;;  %714 = vmatpush1.bf16.msra.mxu1 %v1996_v18 }
 0x163   :  { %674 = vmatprep.subr.bf16.mxu0 %v1992_v17  ;;  %715 = vmatprep.subr.bf16.mxu1 %v1999_v19 }
 0x166   :  { %675 = vmatpush1.bf16.msra.mxu0 %v2002_v20  ;;  %716 = vmatpush1.bf16.msra.mxu1 %v2008_v22 }
 0x167   :  { %676 = vmatprep.subr.bf16.mxu0 %v2004_v21  ;;  %717 = vmatprep.subr.bf16.mxu1 %v2011_v23 }
 0x16a   :  { %677 = vmatpush1.bf16.msra.mxu0 %v2014_v24  ;;  %718 = vmatpush1.bf16.msra.mxu1 %v2018_v25 }
 0x16b   :  { %812 = vmatprep.subr.bf16.mxu0 %v1924_v57  ;;  %853 = vmatprep.subr.bf16.mxu1 %v1933_v61 }
 0x220   :  { %v546_v33 = vpop.f32.mrb[4].mxu0  ;;  %v587_v34 = vpop.f32.mrb[4].mxu1 }
 0x221   :  { %v594_v35 = vadd.f32 %v1548_v31, %v546_v33  ;;  %v548_v36 = vpop.f32.mrb[5].mxu0  ;;  %v589_v37 = vpop.f32.mrb[5].mxu1  ;;  %v596_v49 = vadd.f32 %v1550_v47, %v587_v34 }
 0x222   :  { %v595_v38 = vadd.f32 %v1549_v32, %v548_v36  ;;  %v550_v39 = vpop.f32.mrb[6].mxu0  ;;  %v591_v40 = vpop.f32.mrb[6].mxu1  ;;  %v597_v46 = vadd.f32 %v1551_v45, %v589_v37  ;;  %v1557_v36 = vld [vmem:[%s2464_s0 + $0x48] sm:$0xff] }
 0x223   :  { %v1552_v41 = vmul.f32 -1.442695, %v594_v35  ;;  %v551_v42 = vpop.f32.mrb[7].mxu0  ;;  %v592_v43 = vpop.f32.mrb[7].mxu1 }
 0x224   :  { %v1553_v44 = vmul.f32 -1.442695, %v595_v38  ;;  %v1554_v48 = vmul.f32 -1.442695, %v597_v46 }
 0x225   :  { %1622 = vpow2.f32 %v1552_v41 }
 0x226   :  { %1624 = vpow2.f32 %v1553_v44 }
 0x227   :  { %1626 = vpow2.f32 %v1554_v48  ;;  %v1559_v48 = vld [vmem:[%s2464_s0 + $0x58] sm:$0xff] }
 0x228   :  { %1628 = vtanh.f32 %v596_v49 }
 0x22f   :  { %v1623_v50 = vpop.eup %1622 }
 0x230   :  { %v1625_v51 = vpop.eup %1624  ;;  %v601_v52 = vadd.f32 1.0, %v1623_v50  ;;  %v1558_v50 = vld [vmem:[%s2464_s0 + $0x50] sm:$0xff] }
 0x231   :  { %v607_v53 = vadd.f32 1.0, %v1625_v51  ;;  %v1627_v54 = vpop.eup %1626 }
 0x232   :  { %1630 = vrcp.f32 %v601_v52  ;;  %v1629_v55 = vpop.eup %1628  ;;  %v614_v29 = vadd.f32 1.0, %v1627_v54 }
 0x233   :  { %1632 = vrcp.f32 %v607_v53 }
 0x234   :  { %1634 = vrcp.f32 %v614_v29 }
 0x23c   :  { %v1631_v56 = vpop.eup %1630 }
 0x23d   :  { %v1633_v27 = vpop.eup %1632  ;;  %v618_v28 = vmul.f32 %v1631_v56, %v1629_v55 }
 0x23e   :  { %v617_v30 = vmul.f32 %v1633_v27, %v2070_v26  ;;  %v1635_v32 = vpop.eup %1634  ;;  %v1556_v26 = vld [vmem:[%s2464_s0 + $0x40] sm:$0xff] }
 0x240   :  { %v2123_v31 = vadd.f32 %v618_v28, %v617_v30 }
 0x242   :  { %1636 = vtanh.f32 %v2123_v31 }
 0x24c   :  { %v1637_v33 = vpop.eup %1636 }
 0x24d   :  { %v621_v34 = vmul.f32 %v1637_v33, %v1635_v32 }
 0x24f   :  { %v622_v35 = vpack.c.bf16 %v621_v34, %v621_v34 }
 0x251   :  { %1555 = vst [vmem:[%s2466_s2 + $0x4] sm:$0xf] %v622_v35  ;;  %695 = vmatmul.mubr.bf16.vlgmr.msra.gmra.mrb[8].mxu0 %v622_v35  ;;  %736 = vmatmul.mubr.bf16.vlgmr.msra.gmra.mrb[8].mxu1 %v622_v35 }
 0x252   :  { %813 = vmatpush1.bf16.msra.mxu0 %v1926_v58  ;;  %854 = vmatpush1.bf16.msra.mxu1 %v1940_v63 }
 0x253   :  { %814 = vmatprep.subr.bf16.mxu0 %v1928_v59  ;;  %855 = vmatprep.subr.bf16.mxu1 %v1942_v0 }
 0x254   :  { %844 = vmatprep.mubr.bf16.mxu0 %v1736_v60  ;;  %885 = vmatprep.mubr.bf16.mxu1 %v1736_v60 }
 0x256   :  { %815 = vmatpush1.bf16.msra.mxu0 %v1937_v62  ;;  %856 = vmatpush1.bf16.msra.mxu1 %v1948_v2 }
 0x257   :  { %816 = vmatprep.subr.bf16.mxu0 %v1944_v1  ;;  %857 = vmatprep.subr.bf16.mxu1 %v1951_v3 }
 0x25a   :  { %817 = vmatpush1.bf16.msra.mxu0 %v1954_v4  ;;  %858 = vmatpush1.bf16.msra.mxu1 %v1960_v6 }
 0x25b   :  { %818 = vmatprep.subr.bf16.mxu0 %v1956_v5  ;;  %859 = vmatprep.subr.bf16.mxu1 %v1963_v7 }
 0x25e   :  { %819 = vmatpush1.bf16.msra.mxu0 %v1966_v8  ;;  %860 = vmatpush1.bf16.msra.mxu1 %v1972_v10 }
 0x25f   :  { %820 = vmatprep.subr.bf16.mxu0 %v1968_v9  ;;  %861 = vmatprep.subr.bf16.mxu1 %v1975_v11 }
 0x262   :  { %821 = vmatpush1.bf16.msra.mxu0 %v1978_v12  ;;  %862 = vmatpush1.bf16.msra.mxu1 %v1984_v14 }
 0x263   :  { %822 = vmatprep.subr.bf16.mxu0 %v1980_v13  ;;  %863 = vmatprep.subr.bf16.mxu1 %v1987_v15 }
 0x266   :  { %823 = vmatpush1.bf16.msra.mxu0 %v1990_v16  ;;  %864 = vmatpush1.bf16.msra.mxu1 %v1996_v18 }
 0x267   :  { %824 = vmatprep.subr.bf16.mxu0 %v1992_v17  ;;  %865 = vmatprep.subr.bf16.mxu1 %v1999_v19 }
 0x26a   :  { %825 = vmatpush1.bf16.msra.mxu0 %v2002_v20  ;;  %866 = vmatpush1.bf16.msra.mxu1 %v2008_v22 }
 0x26b   :  { %826 = vmatprep.subr.bf16.mxu0 %v2004_v21  ;;  %867 = vmatprep.subr.bf16.mxu1 %v2011_v23 }
 0x26e   :  { %827 = vmatpush1.bf16.msra.mxu0 %v2014_v24  ;;  %868 = vmatpush1.bf16.msra.mxu1 %v2018_v25 }
 0x26f   :  { %962 = vmatprep.subr.bf16.mxu0 %v1924_v57  ;;  %1003 = vmatprep.subr.bf16.mxu1 %v1933_v61 }
 0x324   :  { %v696_v37 = vpop.f32.mrb[8].mxu0  ;;  %v737_v38 = vpop.f32.mrb[8].mxu1 }
 0x325   :  { %v744_v39 = vadd.f32 %v1556_v26, %v696_v37  ;;  %v698_v40 = vpop.f32.mrb[9].mxu0  ;;  %v739_v41 = vpop.f32.mrb[9].mxu1  ;;  %v746_v52 = vadd.f32 %v1558_v50, %v737_v38 }
 0x326   :  { %v745_v42 = vadd.f32 %v1557_v36, %v698_v40  ;;  %v700_v43 = vpop.f32.mrb[10].mxu0  ;;  %v741_v44 = vpop.f32.mrb[10].mxu1  ;;  %v747_v49 = vadd.f32 %v1559_v48, %v739_v41 }
 0x327   :  { %v1560_v45 = vmul.f32 -1.442695, %v744_v39  ;;  %v701_v57 = vpop.f32.mrb[11].mxu0  ;;  %v742_v46 = vpop.f32.mrb[11].mxu1 }
 0x328   :  { %v1561_v47 = vmul.f32 -1.442695, %v745_v42  ;;  %v1562_v51 = vmul.f32 -1.442695, %v747_v49 }
 0x329   :  { %1638 = vpow2.f32 %v1560_v45 }
 0x32a   :  { %1640 = vpow2.f32 %v1561_v47 }
 0x32b   :  { %1642 = vpow2.f32 %v1562_v51 }
 0x32c   :  { %1644 = vtanh.f32 %v746_v52 }
 0x333   :  { %v1639_v53 = vpop.eup %1638 }
 0x334   :  { %v1641_v54 = vpop.eup %1640  ;;  %v751_v55 = vadd.f32 1.0, %v1639_v53 }
 0x335   :  { %v757_v56 = vadd.f32 1.0, %v1641_v54  ;;  %v1643_v27 = vpop.eup %1642 }
 0x336   :  { %1646 = vrcp.f32 %v751_v55  ;;  %v1645_v28 = vpop.eup %1644  ;;  %v764_v33 = vadd.f32 1.0, %v1643_v27  ;;  %v2292_v55 = vld [vmem:[#allocation2 + $0xc0] sm:$0xff] }
 0x337   :  { %1648 = vrcp.f32 %v757_v56  ;;  %v2294_v56 = vld [vmem:[#allocation2 + $0xe8] sm:$0xff]  ;;  %v2298_v27 = vld [vmem:[#allocation2 + $0xe0] sm:$0xff] }
 0x338   :  { %1650 = vrcp.f32 %v764_v33 }
 0x340   :  { %v1647_v29 = vpop.eup %1646 }
 0x341   :  { %v1649_v30 = vpop.eup %1648  ;;  %v768_v32 = vmul.f32 %v1647_v29, %v1645_v28  ;;  %v1572_v28 = vld [vmem:[%s2464_s0 + $0x80] sm:$0xff]  ;;  %v1573_v29 = vld [vmem:[%s2464_s0 + $0x88] sm:$0xff] }
 0x342   :  { %v767_v34 = vmul.f32 %v1649_v30, %v2123_v31  ;;  %v1651_v26 = vpop.eup %1650 }
 0x344   :  { %v2176_v35 = vadd.f32 %v768_v32, %v767_v34 }
 0x346   :  { %1652 = vtanh.f32 %v2176_v35 }
 0x350   :  { %v1653_v36 = vpop.eup %1652 }
 0x351   :  { %v771_v37 = vmul.f32 %v1653_v36, %v1651_v26 }
 0x353   :  { %v772_v38 = vpack.c.bf16 %v771_v37, %v771_v37 }
 0x355   :  { %1563 = vst [vmem:[%s2466_s2 + $0x8] sm:$0xf] %v772_v38  ;;  %845 = vmatmul.mubr.bf16.vlgmr.msra.gmra.mrb[12].mxu0 %v772_v38  ;;  %886 = vmatmul.mubr.bf16.vlgmr.msra.gmra.mrb[12].mxu1 %v772_v38 }
 0x356   :  { %963 = vmatpush1.bf16.msra.mxu0 %v1926_v58  ;;  %1004 = vmatpush1.bf16.msra.mxu1 %v1940_v63  ;;  %v1564_v58 = vld [vmem:[%s2464_s0 + $0x60] sm:$0xff] }
 0x357   :  { %964 = vmatprep.subr.bf16.mxu0 %v1928_v59  ;;  %1005 = vmatprep.subr.bf16.mxu1 %v1942_v0  ;;  %v1565_v59 = vld [vmem:[%s2464_s0 + $0x68] sm:$0xff] }
 0x358   :  { %994 = vmatprep.mubr.bf16.mxu0 %v1736_v60  ;;  %1035 = vmatprep.mubr.bf16.mxu1 %v1736_v60 }
 0x35a   :  { %965 = vmatpush1.bf16.msra.mxu0 %v1937_v62  ;;  %1006 = vmatpush1.bf16.msra.mxu1 %v1948_v2 }
 0x35b   :  { %966 = vmatprep.subr.bf16.mxu0 %v1944_v1  ;;  %1007 = vmatprep.subr.bf16.mxu1 %v1951_v3 }
 0x35e   :  { %967 = vmatpush1.bf16.msra.mxu0 %v1954_v4  ;;  %1008 = vmatpush1.bf16.msra.mxu1 %v1960_v6 }
 0x35f   :  { %968 = vmatprep.subr.bf16.mxu0 %v1956_v5  ;;  %1009 = vmatprep.subr.bf16.mxu1 %v1963_v7 }
 0x362   :  { %969 = vmatpush1.bf16.msra.mxu0 %v1966_v8  ;;  %1010 = vmatpush1.bf16.msra.mxu1 %v1972_v10 }
 0x363   :  { %970 = vmatprep.subr.bf16.mxu0 %v1968_v9  ;;  %1011 = vmatprep.subr.bf16.mxu1 %v1975_v11 }
 0x366   :  { %971 = vmatpush1.bf16.msra.mxu0 %v1978_v12  ;;  %1012 = vmatpush1.bf16.msra.mxu1 %v1984_v14 }
 0x367   :  { %972 = vmatprep.subr.bf16.mxu0 %v1980_v13  ;;  %1013 = vmatprep.subr.bf16.mxu1 %v1987_v15 }
 0x36a   :  { %973 = vmatpush1.bf16.msra.mxu0 %v1990_v16  ;;  %1014 = vmatpush1.bf16.msra.mxu1 %v1996_v18 }
 0x36b   :  { %974 = vmatprep.subr.bf16.mxu0 %v1992_v17  ;;  %1015 = vmatprep.subr.bf16.mxu1 %v1999_v19 }
 0x36e   :  { %975 = vmatpush1.bf16.msra.mxu0 %v2002_v20  ;;  %1016 = vmatpush1.bf16.msra.mxu1 %v2008_v22 }
 0x36f   :  { %976 = vmatprep.subr.bf16.mxu0 %v2004_v21  ;;  %1017 = vmatprep.subr.bf16.mxu1 %v2011_v23  ;;  %v1567_v21 = vld [vmem:[%s2464_s0 + $0x78] sm:$0xff] }
 0x372   :  { %977 = vmatpush1.bf16.msra.mxu0 %v2014_v24  ;;  %1018 = vmatpush1.bf16.msra.mxu1 %v2018_v25  ;;  %v1566_v25 = vld [vmem:[%s2464_s0 + $0x70] sm:$0xff] }
 0x373   :  { %1153 = vmatprep.subr.bf16.mxu1 %v1933_v61 }
 0x428   :  { %v846_v62 = vpop.f32.mrb[12].mxu0  ;;  %v887_v1 = vpop.f32.mrb[12].mxu1 }
 0x429   :  { %v894_v4 = vadd.f32 %v1564_v58, %v846_v62  ;;  %v848_v5 = vpop.f32.mrb[13].mxu0  ;;  %v889_v8 = vpop.f32.mrb[13].mxu1  ;;  %v896_v39 = vadd.f32 %v1566_v25, %v887_v1  ;;  %v1575_v1 = vld [vmem:[%s2464_s0 + $0x98] sm:$0xff] }
 0x42a   :  { %v895_v9 = vadd.f32 %v1565_v59, %v848_v5  ;;  %v850_v12 = vpop.f32.mrb[14].mxu0  ;;  %v891_v13 = vpop.f32.mrb[14].mxu1  ;;  %v897_v24 = vadd.f32 %v1567_v21, %v889_v8  ;;  %v1574_v5 = vld [vmem:[%s2464_s0 + $0x90] sm:$0xff] }
 0x42b   :  { %v1568_v16 = vmul.f32 -1.442695, %v894_v4  ;;  %v851_v17 = vpop.f32.mrb[15].mxu0  ;;  %v892_v20 = vpop.f32.mrb[15].mxu1 }
 0x42c   :  { %v1569_v61 = vmul.f32 -1.442695, %v895_v9  ;;  %v1570_v31 = vmul.f32 -1.442695, %v897_v24 }
 0x42d   :  { %1654 = vpow2.f32 %v1568_v16 }
 0x42e   :  { %1656 = vpow2.f32 %v1569_v61 }
 0x42f   :  { %1658 = vpow2.f32 %v1570_v31 }
 0x430   :  { %1660 = vtanh.f32 %v896_v39 }
 0x437   :  { %v1655_v40 = vpop.eup %1654 }
 0x438   :  { %v1657_v41 = vpop.eup %1656  ;;  %v901_v42 = vadd.f32 1.0, %v1655_v40 }
 0x439   :  { %v907_v43 = vadd.f32 1.0, %v1657_v41  ;;  %v1659_v44 = vpop.eup %1658 }
 0x43a   :  { %1662 = vrcp.f32 %v901_v42  ;;  %v1661_v45 = vpop.eup %1660  ;;  %v914_v48 = vadd.f32 1.0, %v1659_v44 }
 0x43b   :  { %1664 = vrcp.f32 %v907_v43 }
 0x43c   :  { %1666 = vrcp.f32 %v914_v48  ;;  %v2348_v48 = vld [vmem:[#allocation2 + $0x58] sm:$0xff] }
 0x444   :  { %v1663_v57 = vpop.eup %1662 }
 0x445   :  { %v1665_v46 = vpop.eup %1664  ;;  %v918_v47 = vmul.f32 %v1663_v57, %v1661_v45  ;;  %v1233_v45 = vld [vmem:[#allocation2 + $0x18] sm:$0xff]  ;;  %v2339_v57 = vld [vmem:[#allocation2 + $0x10] sm:$0xff] }
 0x446   :  { %v917_v49 = vmul.f32 %v1665_v46, %v2176_v35  ;;  %v1667_v51 = vpop.eup %1666  ;;  %v2342_v46 = vld [vmem:[#allocation2 + $0x38] sm:$0xff] }
 0x448   :  { %v2228_v50 = vadd.f32 %v918_v47, %v917_v49  ;;  %v2345_v47 = vld [vmem:[#allocation2 + $0x30] sm:$0xff] }
 0x449   :  { %v2351_v49 = vld [vmem:[#allocation2 + $0x50] sm:$0xff] }
 0x44a   :  { %1668 = vtanh.f32 %v2228_v50 }
 0x454   :  { %v1669_v52 = vpop.eup %1668 }
 0x455   :  { %v921_v53 = vmul.f32 %v1669_v52, %v1667_v51  ;;  %v2357_v51 = vld [vmem:[#allocation2 + $0x70] sm:$0xff]  ;;  %v2360_v52 = vld [vmem:[#allocation2 + $0x98] sm:$0xff] }
 0x457   :  { %v922_v54 = vpack.c.bf16 %v921_v53, %v921_v53  ;;  %v2362_v53 = vld [vmem:[#allocation2 + $0x90] sm:$0xff] }
 0x459   :  { %1571 = vst [vmem:[%s2466_s2 + $0xc] sm:$0xf] %v922_v54  ;;  %995 = vmatmul.mubr.bf16.vlgmr.msra.gmra.mrb[16].mxu0 %v922_v54  ;;  %1036 = vmatmul.mubr.bf16.vlgmr.msra.gmra.mrb[16].mxu1 %v922_v54  ;;  %v2365_v54 = vld [vmem:[#allocation2 + $0xb8] sm:$0xff] }
 0x45a   :  { %1154 = vmatpush1.bf16.msra.mxu1 %v1940_v63  ;;  %1144 = vmatprep.mubr.bf16.mxu0 %v1736_v60  ;;  %v2250_v63 = vld [vmem:[#allocation2 + $0x8] sm:$0xff] }
 0x45b   :  { %1155 = vmatprep.subr.bf16.mxu1 %v1942_v0  ;;  %1185 = vmatprep.mubr.bf16.mxu1 %v1736_v60  ;;  %v2253_v0 = vld [vmem:[#allocation2] sm:$0xff] }
 0x45c   :  { %1112 = vmatprep.subr.bf16.mxu0 %v2250_v63 }
 0x45d   :  { %1113 = vmatpush1.bf16.msra.mxu0 %v2253_v0 }
 0x45e   :  { %1156 = vmatpush1.bf16.msra.mxu1 %v1948_v2  ;;  %v2256_v2 = vld [vmem:[#allocation2 + $0x28] sm:$0xff] }
 0x45f   :  { %1157 = vmatprep.subr.bf16.mxu1 %v1951_v3  ;;  %1114 = vmatprep.subr.bf16.mxu0 %v2256_v2  ;;  %v2259_v3 = vld [vmem:[#allocation2 + $0x20] sm:$0xff] }
 0x461   :  { %1115 = vmatpush1.bf16.msra.mxu0 %v2259_v3 }
 0x462   :  { %1158 = vmatpush1.bf16.msra.mxu1 %v1960_v6  ;;  %v2262_v6 = vld [vmem:[#allocation2 + $0x48] sm:$0xff] }
 0x463   :  { %1159 = vmatprep.subr.bf16.mxu1 %v1963_v7  ;;  %1116 = vmatprep.subr.bf16.mxu0 %v2262_v6  ;;  %v2265_v7 = vld [vmem:[#allocation2 + $0x40] sm:$0xff] }
 0x465   :  { %1117 = vmatpush1.bf16.msra.mxu0 %v2265_v7 }
 0x466   :  { %1160 = vmatpush1.bf16.msra.mxu1 %v1972_v10  ;;  %v2268_v10 = vld [vmem:[#allocation2 + $0x68] sm:$0xff] }
 0x467   :  { %1161 = vmatprep.subr.bf16.mxu1 %v1975_v11  ;;  %1118 = vmatprep.subr.bf16.mxu0 %v2268_v10  ;;  %v2271_v11 = vld [vmem:[#allocation2 + $0x60] sm:$0xff] }
 0x469   :  { %1119 = vmatpush1.bf16.msra.mxu0 %v2271_v11 }
 0x46a   :  { %1162 = vmatpush1.bf16.msra.mxu1 %v1984_v14  ;;  %v2274_v14 = vld [vmem:[#allocation2 + $0x88] sm:$0xff] }
 0x46b   :  { %1163 = vmatprep.subr.bf16.mxu1 %v1987_v15  ;;  %v2276_v15 = vld [vmem:[#allocation2 + $0x80] sm:$0xff]  ;;  %1120 = vmatprep.subr.bf16.mxu0 %v2274_v14 }
 0x46d   :  { %1121 = vmatpush1.bf16.msra.mxu0 %v2276_v15 }
 0x46e   :  { %1164 = vmatpush1.bf16.msra.mxu1 %v1996_v18  ;;  %v2279_v18 = vld [vmem:[#allocation2 + $0xa8] sm:$0xff] }
 0x46f   :  { %1165 = vmatprep.subr.bf16.mxu1 %v1999_v19  ;;  %v2281_v19 = vld [vmem:[#allocation2 + $0xf0] sm:$0xff]  ;;  %1122 = vmatprep.subr.bf16.mxu0 %v2279_v18 }
 0x472   :  { %1166 = vmatpush1.bf16.msra.mxu1 %v2008_v22  ;;  %v2286_v22 = vld [vmem:[#allocation2 + $0xa0] sm:$0xff] }
 0x473   :  { %1167 = vmatprep.subr.bf16.mxu1 %v2011_v23  ;;  %v2288_v23 = vld [vmem:[#allocation2 + $0xc8] sm:$0xff]  ;;  %1123 = vmatpush1.bf16.msra.mxu0 %v2286_v22 }
 0x474   :  { %1124 = vmatprep.subr.bf16.mxu0 %v2288_v23 }
 0x476   :  { %1168 = vmatpush1.bf16.msra.mxu1 %v2281_v19 }
 0x477   :  { %1125 = vmatpush1.bf16.msra.mxu0 %v2292_v55  ;;  %1303 = vmatprep.subr.bf16.mxu1 %v1233_v45 }
 0x478   :  { %1126 = vmatprep.subr.bf16.mxu0 %v2294_v56 }
 0x47b   :  { %1127 = vmatpush1.bf16.msra.mxu0 %v2298_v27 }
 0x47c   :  { %1262 = vmatprep.subr.bf16.mxu0 %v2250_v63 }
 0x52c   :  { %v996_v30 = vpop.f32.mrb[16].mxu0  ;;  %v1037_v32 = vpop.f32.mrb[16].mxu1 }
 0x52d   :  { %v1044_v33 = vadd.f32 %v1572_v28, %v996_v30  ;;  %v998_v34 = vpop.f32.mrb[17].mxu0  ;;  %v1039_v35 = vpop.f32.mrb[17].mxu1  ;;  %v1046_v9 = vadd.f32 %v1574_v5, %v1037_v32  ;;  %v2371_v28 = vld [vmem:[#allocation2 + $0xd8] sm:$0xff]  ;;  %v1580_v32 = vld [vmem:[%s2464_s0 + $0xa0] sm:$0xff] }
 0x52e   :  { %v1045_v26 = vadd.f32 %v1573_v29, %v998_v34  ;;  %v1000_v36 = vpop.f32.mrb[18].mxu0  ;;  %v1041_v37 = vpop.f32.mrb[18].mxu1  ;;  %v1047_v4 = vadd.f32 %v1575_v1, %v1039_v35  ;;  %v2375_v29 = vld [vmem:[#allocation2 + $0xd0] sm:$0xff]  ;;  %v2377_v30 = vld [vmem:[#allocation2 + $0xf8] sm:$0xff] }
 0x52f   :  { %v1576_v38 = vmul.f32 -1.442695, %v1044_v33  ;;  %v1001_v58 = vpop.f32.mrb[19].mxu0  ;;  %v1042_v59 = vpop.f32.mrb[19].mxu1  ;;  %v1581_v33 = vld [vmem:[%s2464_s0 + $0xa8] sm:$0xff] }
 0x530   :  { %v1577_v62 = vmul.f32 -1.442695, %v1045_v26  ;;  %v1578_v8 = vmul.f32 -1.442695, %v1047_v4 }
 0x531   :  { %1670 = vpow2.f32 %v1576_v38 }
 0x532   :  { %1672 = vpow2.f32 %v1577_v62 }
 0x533   :  { %1674 = vpow2.f32 %v1578_v8  ;;  %v1583_v8 = vld [vmem:[%s2464_s0 + $0xb8] sm:$0xff] }
 0x534   :  { %1676 = vtanh.f32 %v1046_v9 }
 0x53b   :  { %v1671_v12 = vpop.eup %1670 }
 0x53c   :  { %v1673_v13 = vpop.eup %1672  ;;  %v1051_v16 = vadd.f32 1.0, %v1671_v12  ;;  %v1582_v12 = vld [vmem:[%s2464_s0 + $0xb0] sm:$0xff] }
 0x53d   :  { %v1057_v17 = vadd.f32 1.0, %v1673_v13  ;;  %v1675_v20 = vpop.eup %1674 }
 0x53e   :  { %1678 = vrcp.f32 %v1051_v16  ;;  %v1677_v61 = vpop.eup %1676  ;;  %v1064_v31 = vadd.f32 1.0, %v1675_v20 }
 0x53f   :  { %1680 = vrcp.f32 %v1057_v17 }
 0x540   :  { %1682 = vrcp.f32 %v1064_v31 }
 0x548   :  { %v1679_v21 = vpop.eup %1678 }
 0x549   :  { %v1681_v24 = vpop.eup %1680  ;;  %v1068_v25 = vmul.f32 %v1679_v21, %v1677_v61 }
 0x54a   :  { %v1067_v39 = vmul.f32 %v1681_v24, %v2228_v50  ;;  %v1683_v41 = vpop.eup %1682  ;;  %v2354_v50 = vld [vmem:[#allocation2 + $0x78] sm:$0xff] }
 0x54c   :  { %v2315_v40 = vadd.f32 %v1068_v25, %v1067_v39 }
 0x54e   :  { %1684 = vtanh.f32 %v2315_v40 }
 0x558   :  { %v1685_v42 = vpop.eup %1684 }
 0x559   :  { %v1071_v43 = vmul.f32 %v1685_v42, %v1683_v41 }
 0x55b   :  { %v1072_v44 = vpack.c.bf16 %v1071_v43, %v1071_v43 }
 0x55d   :  { %1579 = vst [vmem:[%s2466_s2 + $0x10] sm:$0xf] %v1072_v44  ;;  %1145 = vmatmul.mubr.bf16.vlgmr.msra.gmra.mrb[20].mxu0 %v1072_v44  ;;  %1186 = vmatmul.mubr.bf16.vlgmr.msra.gmra.mrb[20].mxu1 %v1072_v44 }
 0x55e   :  { %1263 = vmatpush1.bf16.msra.mxu0 %v2253_v0  ;;  %1294 = vmatprep.mubr.bf16.mxu0 %v1736_v60 }
 0x55f   :  { %1264 = vmatprep.subr.bf16.mxu0 %v2256_v2  ;;  %1335 = vmatprep.mubr.bf16.mxu1 %v1736_v60 }
 0x560   :  { %1304 = vmatpush1.bf16.msra.mxu1 %v2339_v57 }
 0x561   :  { %1305 = vmatprep.subr.bf16.mxu1 %v2342_v46 }
 0x562   :  { %1265 = vmatpush1.bf16.msra.mxu0 %v2259_v3 }
 0x563   :  { %1266 = vmatprep.subr.bf16.mxu0 %v2262_v6 }
 0x564   :  { %1306 = vmatpush1.bf16.msra.mxu1 %v2345_v47 }
 0x565   :  { %1307 = vmatprep.subr.bf16.mxu1 %v2348_v48 }
 0x566   :  { %1267 = vmatpush1.bf16.msra.mxu0 %v2265_v7 }
 0x567   :  { %1268 = vmatprep.subr.bf16.mxu0 %v2268_v10 }
 0x568   :  { %1308 = vmatpush1.bf16.msra.mxu1 %v2351_v49 }
 0x569   :  { %1309 = vmatprep.subr.bf16.mxu1 %v2354_v50 }
 0x56a   :  { %1269 = vmatpush1.bf16.msra.mxu0 %v2271_v11 }
 0x56b   :  { %1270 = vmatprep.subr.bf16.mxu0 %v2274_v14 }
 0x56c   :  { %1310 = vmatpush1.bf16.msra.mxu1 %v2357_v51 }
 0x56d   :  { %1311 = vmatprep.subr.bf16.mxu1 %v2360_v52 }
 0x56e   :  { %1271 = vmatpush1.bf16.msra.mxu0 %v2276_v15 }
 0x56f   :  { %1272 = vmatprep.subr.bf16.mxu0 %v2279_v18 }
 0x570   :  { %1312 = vmatpush1.bf16.msra.mxu1 %v2362_v53 }
 0x571   :  { %1313 = vmatprep.subr.bf16.mxu1 %v2365_v54 }
 0x572   :  { %1273 = vmatpush1.bf16.msra.mxu0 %v2286_v22 }
 0x573   :  { %1274 = vmatprep.subr.bf16.mxu0 %v2288_v23 }
 0x576   :  { %1275 = vmatpush1.bf16.msra.mxu0 %v2292_v55 }
 0x577   :  { %1276 = vmatprep.subr.bf16.mxu0 %v2294_v56 }
 0x57a   :  { %1277 = vmatpush1.bf16.msra.mxu0 %v2298_v27 }
 0x57b   :  { %1412 = vmatprep.subr.bf16.mxu0 %v2250_v63  ;;  %v2369_v63 = vld [vmem:[#allocation2 + $0xb0] sm:$0xff] }
 0x57c   :  { %1314 = vmatpush1.bf16.msra.mxu1 %v2369_v63 }
 0x57d   :  { %1315 = vmatprep.subr.bf16.mxu1 %v2371_v28 }
 0x580   :  { %1316 = vmatpush1.bf16.msra.mxu1 %v2375_v29 }
 0x581   :  { %1317 = vmatprep.subr.bf16.mxu1 %v2377_v30 }
 0x584   :  { %1318 = vmatpush1.bf16.msra.mxu1 %v2281_v19 }
 0x585   :  { %1453 = vmatprep.subr.bf16.mxu1 %v1233_v45 }
 0x630   :  { %v1146_v34 = vpop.f32.mrb[20].mxu0  ;;  %v1187_v35 = vpop.f32.mrb[20].mxu1 }
 0x631   :  { %v1194_v26 = vadd.f32 %v1580_v32, %v1146_v34  ;;  %v1148_v36 = vpop.f32.mrb[21].mxu0  ;;  %v1189_v37 = vpop.f32.mrb[21].mxu1  ;;  %v1196_v16 = vadd.f32 %v1582_v12, %v1187_v35 }
 0x632   :  { %v1195_v38 = vadd.f32 %v1581_v33, %v1148_v36  ;;  %v1150_v58 = vpop.f32.mrb[22].mxu0  ;;  %v1191_v59 = vpop.f32.mrb[22].mxu1  ;;  %v1197_v9 = vadd.f32 %v1583_v8, %v1189_v37  ;;  %v1596_v37 = vld [vmem:[%s2464_s0 + $0xe0] sm:$0xff] }
 0x633   :  { %v1584_v62 = vmul.f32 -1.442695, %v1194_v26  ;;  %v1151_v1 = vpop.f32.mrb[23].mxu0  ;;  %v1192_v4 = vpop.f32.mrb[23].mxu1 }
 0x634   :  { %v1585_v5 = vmul.f32 -1.442695, %v1195_v38  ;;  %v1586_v13 = vmul.f32 -1.442695, %v1197_v9  ;;  %v1597_v38 = vld [vmem:[%s2464_s0 + $0xe8] sm:$0xff] }
 0x635   :  { %1686 = vpow2.f32 %v1584_v62 }
 0x636   :  { %1688 = vpow2.f32 %v1585_v5 }
 0x637   :  { %1690 = vpow2.f32 %v1586_v13 }
 0x638   :  { %1692 = vtanh.f32 %v1196_v16 }
 0x63f   :  { %v1687_v17 = vpop.eup %1686 }
 0x640   :  { %v1689_v20 = vpop.eup %1688  ;;  %v1201_v61 = vadd.f32 1.0, %v1687_v17 }
 0x641   :  { %v1207_v21 = vadd.f32 1.0, %v1689_v20  ;;  %v1691_v24 = vpop.eup %1690  ;;  %v1599_v20 = vld [vmem:[%s2464_s0 + $0xf8] sm:$0xff] }
 0x642   :  { %1694 = vrcp.f32 %v1201_v61  ;;  %v1693_v25 = vpop.eup %1692  ;;  %v1214_v42 = vadd.f32 1.0, %v1691_v24 }
 0x643   :  { %1696 = vrcp.f32 %v1207_v21  ;;  %v1598_v21 = vld [vmem:[%s2464_s0 + $0xf0] sm:$0xff] }
 0x644   :  { %1698 = vrcp.f32 %v1214_v42 }
 0x64c   :  { %v1695_v31 = vpop.eup %1694 }
 0x64d   :  { %v1697_v39 = vpop.eup %1696  ;;  %v1218_v41 = vmul.f32 %v1695_v31, %v1693_v25 }
 0x64e   :  { %v1217_v43 = vmul.f32 %v1697_v39, %v2315_v40  ;;  %v1699_v45 = vpop.eup %1698 }
 0x650   :  { %v2395_v44 = vadd.f32 %v1218_v41, %v1217_v43 }
 0x652   :  { %1700 = vtanh.f32 %v2395_v44 }
 0x65c   :  { %v1701_v32 = vpop.eup %1700 }
 0x65d   :  { %v1221_v33 = vmul.f32 %v1701_v32, %v1699_v45 }
 0x65f   :  { %v1222_v34 = vpack.c.bf16 %v1221_v33, %v1221_v33 }
 0x661   :  { %1587 = vst [vmem:[%s2466_s2 + $0x14] sm:$0xf] %v1222_v34  ;;  %1295 = vmatmul.mubr.bf16.vlgmr.msra.gmra.mrb[24].mxu0 %v1222_v34  ;;  %1336 = vmatmul.mubr.bf16.vlgmr.msra.gmra.mrb[24].mxu1 %v1222_v34 }
 0x662   :  { %1413 = vmatpush1.bf16.msra.mxu0 %v2253_v0  ;;  %1454 = vmatpush1.bf16.msra.mxu1 %v2339_v57  ;;  %v1589_v0 = vld [vmem:[%s2464_s0 + $0xc8] sm:$0xff] }
 0x663   :  { %1414 = vmatprep.subr.bf16.mxu0 %v2256_v2  ;;  %1455 = vmatprep.subr.bf16.mxu1 %v2342_v46 }
 0x664   :  { %1444 = vmatprep.mubr.bf16.mxu0 %v1736_v60  ;;  %1485 = vmatprep.mubr.bf16.mxu1 %v1736_v60  ;;  %v1588_v60 = vld [vmem:[%s2464_s0 + $0xc0] sm:$0xff] }
 0x666   :  { %1415 = vmatpush1.bf16.msra.mxu0 %v2259_v3  ;;  %1456 = vmatpush1.bf16.msra.mxu1 %v2345_v47 }
 0x667   :  { %1416 = vmatprep.subr.bf16.mxu0 %v2262_v6  ;;  %1457 = vmatprep.subr.bf16.mxu1 %v2348_v48 }
 0x66a   :  { %1417 = vmatpush1.bf16.msra.mxu0 %v2265_v7  ;;  %1458 = vmatpush1.bf16.msra.mxu1 %v2351_v49 }
 0x66b   :  { %1418 = vmatprep.subr.bf16.mxu0 %v2268_v10  ;;  %1459 = vmatprep.subr.bf16.mxu1 %v2354_v50 }
 0x66e   :  { %1419 = vmatpush1.bf16.msra.mxu0 %v2271_v11  ;;  %1460 = vmatpush1.bf16.msra.mxu1 %v2357_v51 }
 0x66f   :  { %1420 = vmatprep.subr.bf16.mxu0 %v2274_v14  ;;  %1461 = vmatprep.subr.bf16.mxu1 %v2360_v52 }
 0x672   :  { %1421 = vmatpush1.bf16.msra.mxu0 %v2276_v15  ;;  %1462 = vmatpush1.bf16.msra.mxu1 %v2362_v53 }
 0x673   :  { %1422 = vmatprep.subr.bf16.mxu0 %v2279_v18  ;;  %1463 = vmatprep.subr.bf16.mxu1 %v2365_v54 }
 0x676   :  { %1423 = vmatpush1.bf16.msra.mxu0 %v2286_v22  ;;  %1464 = vmatpush1.bf16.msra.mxu1 %v2369_v63 }
 0x677   :  { %1424 = vmatprep.subr.bf16.mxu0 %v2288_v23  ;;  %1465 = vmatprep.subr.bf16.mxu1 %v2371_v28 }
 0x67a   :  { %1425 = vmatpush1.bf16.msra.mxu0 %v2292_v55  ;;  %1466 = vmatpush1.bf16.msra.mxu1 %v2375_v29  ;;  %v1591_v55 = vld [vmem:[%s2464_s0 + $0xd8] sm:$0xff] }
 0x67b   :  { %1426 = vmatprep.subr.bf16.mxu0 %v2294_v56  ;;  %1467 = vmatprep.subr.bf16.mxu1 %v2377_v30 }
 0x67e   :  { %1427 = vmatpush1.bf16.msra.mxu0 %v2298_v27  ;;  %1468 = vmatpush1.bf16.msra.mxu1 %v2281_v19  ;;  %v1590_v27 = vld [vmem:[%s2464_s0 + $0xd0] sm:$0xff] }
 0x734   :  { %v1296_v2 = vpop.f32.mrb[24].mxu0  ;;  %v1337_v3 = vpop.f32.mrb[24].mxu1 }
 0x735   :  { %v1344_v6 = vadd.f32 %v1588_v60, %v1296_v2  ;;  %v1298_v7 = vpop.f32.mrb[25].mxu0  ;;  %v1339_v10 = vpop.f32.mrb[25].mxu1  ;;  %v1346_v57 = vadd.f32 %v1590_v27, %v1337_v3 }
 0x736   :  { %v1345_v11 = vadd.f32 %v1589_v0, %v1298_v7  ;;  %v1300_v14 = vpop.f32.mrb[26].mxu0  ;;  %v1341_v15 = vpop.f32.mrb[26].mxu1  ;;  %v1347_v56 = vadd.f32 %v1591_v55, %v1339_v10 }
 0x737   :  { %v1592_v18 = vmul.f32 -1.442695, %v1344_v6  ;;  %v1301_v22 = vpop.f32.mrb[27].mxu0  ;;  %v1342_v23 = vpop.f32.mrb[27].mxu1 }
 0x738   :  { %v1593_v19 = vmul.f32 -1.442695, %v1345_v11  ;;  %v1594_v40 = vmul.f32 -1.442695, %v1347_v56 }
 0x739   :  { %1702 = vpow2.f32 %v1592_v18 }
 0x73a   :  { %1704 = vpow2.f32 %v1593_v19 }
 0x73b   :  { %1706 = vpow2.f32 %v1594_v40 }
 0x73c   :  { %1708 = vtanh.f32 %v1346_v57 }
 0x743   :  { %v1703_v46 = vpop.eup %1702 }
 0x744   :  { %v1705_v47 = vpop.eup %1704  ;;  %v1351_v48 = vadd.f32 1.0, %v1703_v46 }
 0x745   :  { %v1357_v49 = vadd.f32 1.0, %v1705_v47  ;;  %v1707_v50 = vpop.eup %1706 }
 0x746   :  { %1710 = vrcp.f32 %v1351_v48  ;;  %v1709_v51 = vpop.eup %1708  ;;  %v1364_v63 = vadd.f32 1.0, %v1707_v50 }
 0x747   :  { %1712 = vrcp.f32 %v1357_v49 }
 0x748   :  { %1714 = vrcp.f32 %v1364_v63 }
 0x750   :  { %v1711_v52 = vpop.eup %1710 }
 0x751   :  { %v1713_v53 = vpop.eup %1712  ;;  %v1368_v54 = vmul.f32 %v1711_v52, %v1709_v51 }
 0x752   :  { %v1367_v28 = vmul.f32 %v1713_v53, %v2395_v44  ;;  %v1715_v30 = vpop.eup %1714 }
 0x754   :  { %v1369_v29 = vadd.f32 %v1368_v54, %v1367_v28 }
 0x756   :  { %1716 = vtanh.f32 %v1369_v29 }
 0x760   :  { %v1717_v35 = vpop.eup %1716 }
 0x761   :  { %v1371_v26 = vmul.f32 %v1717_v35, %v1715_v30 }
 0x763   :  { %v1372_v36 = vpack.c.bf16 %v1371_v26, %v1371_v26 }
 0x765   :  { %1595 = vst [vmem:[%s2466_s2 + $0x18] sm:$0xf] %v1372_v36  ;;  %1445 = vmatmul.mubr.bf16.vlgmr.msra.gmra.mrb[28].mxu0 %v1372_v36  ;;  %1486 = vmatmul.mubr.bf16.vlgmr.msra.gmra.mrb[28].mxu1 %v1372_v36 }
 0x838   :  { %v1446_v58 = vpop.f32.mrb[28].mxu0  ;;  %v1487_v59 = vpop.f32.mrb[28].mxu1 }
 0x839   :  { %v1494_v62 = vadd.f32 %v1596_v37, %v1446_v58  ;;  %v1448_v1 = vpop.f32.mrb[29].mxu0  ;;  %v1489_v4 = vpop.f32.mrb[29].mxu1  ;;  %v1496_v25 = vadd.f32 %v1598_v21, %v1487_v59 }
 0x83a   :  { %v1495_v5 = vadd.f32 %v1597_v38, %v1448_v1  ;;  %v1450_v8 = vpop.f32.mrb[30].mxu0  ;;  %v1491_v9 = vpop.f32.mrb[30].mxu1  ;;  %v1497_v61 = vadd.f32 %v1599_v20, %v1489_v4 }
 0x83b   :  { %v1600_v12 = vmul.f32 -1.442695, %v1494_v62  ;;  %v1451_v13 = vpop.f32.mrb[31].mxu0  ;;  %v1492_v16 = vpop.f32.mrb[31].mxu1 }
 0x83c   :  { %v1601_v17 = vmul.f32 -1.442695, %v1495_v5  ;;  %v1602_v24 = vmul.f32 -1.442695, %v1497_v61 }
 0x83d   :  { %1718 = vpow2.f32 %v1600_v12 }
 0x83e   :  { %1720 = vpow2.f32 %v1601_v17 }
 0x83f   :  { %1722 = vpow2.f32 %v1602_v24 }
 0x840   :  { %1724 = vtanh.f32 %v1496_v25 }
 0x847   :  { %v1719_v31 = vpop.eup %1718 }
 0x848   :  { %v1721_v39 = vpop.eup %1720  ;;  %v1501_v41 = vadd.f32 1.0, %v1719_v31 }
 0x849   :  { %v1507_v42 = vadd.f32 1.0, %v1721_v39  ;;  %v1723_v43 = vpop.eup %1722 }
 0x84a   :  { %1726 = vrcp.f32 %v1501_v41  ;;  %v1725_v44 = vpop.eup %1724  ;;  %v1514_v34 = vadd.f32 1.0, %v1723_v43 }
 0x84b   :  { %1728 = vrcp.f32 %v1507_v42 }
 0x84c   :  { %1730 = vrcp.f32 %v1514_v34 }
 0x854   :  { %v1727_v45 = vpop.eup %1726 }
 0x855   :  { %v1729_v32 = vpop.eup %1728  ;;  %v1518_v33 = vmul.f32 %v1727_v45, %v1725_v44 }
 0x856   :  { %v1517_v60 = vmul.f32 %v1729_v32, %v1369_v29  ;;  %v1731_v2 = vpop.eup %1730 }
 0x858   :  { %v1519_v0 = vadd.f32 %v1518_v33, %v1517_v60 }
 0x85a   :  { %1732 = vtanh.f32 %v1519_v0 }
 0x864   :  { %v1733_v3 = vpop.eup %1732 }
 0x865   :  { %v1521_v6 = vmul.f32 %v1733_v3, %v1731_v2 }
 0x867   :  { %v1522_v7 = vpack.c.bf16 %v1521_v6, %v1521_v6 }
 0x869   :  { %1603 = vst [vmem:[%s2466_s2 + $0x1c] sm:$0xf] %v1522_v7 }

</bundles_post_ra>
